<compile_context>
chip_gen: v7x
topology: tpu7x:2x2x1
jax: 0.10.0
libtpu: 0.0.40
codegen_flags: <defaults>
</compile_context>

<pallas_src>
import functools

import jax
import jax.numpy as jnp
from jax import lax
from jax.experimental import pallas as pl
from jax.experimental.pallas import tpu as pltpu


def _conv_stats_kernel(xa_ref, xb_ref, w_ref, st_ref, *, TH, W, Cin, Cout):
  """Stats-only pass: polyphase conv of one row tile + BN partial sums.

  xa_ref : (1, TH, W+1, Cin)   input rows [r0, r0+TH) of the zero-padded NHWC input
  xb_ref : (1, 1,  W+1, Cin)   halo row r0+TH
  w_ref  : (4, Cin, 4*Cout)    per-shift polyphase weight blocks (phase-major cols)
  st_ref : (1, 2, 4*Cout)      per-tile [sum, sum-of-squares] partials (bias excluded)
  """
  C4 = 4 * Cout
  # Cheap leading-axis concat of the Cin-channel tile with its 1-row halo
  # (the expensive 4x channel im2col concat of the old version is gone).
  xt = jnp.concatenate([xa_ref[0], xb_ref[0]], axis=0)          # (TH+1, W+1, Cin)

  acc = jnp.zeros((TH * W, C4), jnp.float32)
  for si in (0, 1):
    for sj in (0, 1):
      xs = xt[si:si + TH, sj:sj + W, :].reshape(TH * W, Cin)
      acc = acc + jnp.dot(xs, w_ref[2 * si + sj],
                          preferred_element_type=jnp.float32)

  st_ref[0] = jnp.concatenate(
      [jnp.sum(acc, axis=0, keepdims=True),
       jnp.sum(acc * acc, axis=0, keepdims=True)], axis=0)       # (2, 4*Cout)


def _conv_bn_relu_kernel(xa_ref, xb_ref, wt_ref, sc_ref, sh_ref, o_ref,
                         *, TH, W, Cin, Cout):
  """Apply pass: recompute the polyphase conv (transposed / NT orientation so the
  output is lane-dense), apply fused BN scale/shift + ReLU, store final activation.

  wt_ref : (4, 4*Cout, Cin)    transposed per-shift weight blocks
  sc_ref : (4*Cout, 1)         BN scale per (phase, channel)
  sh_ref : (4*Cout, 1)         BN shift per (phase, channel)  (conv bias folded/cancelled)
  o_ref  : (1, 4*Cout, TH*W)   final activation, phase-major rows, pixel-major lanes
  """
  C4 = 4 * Cout
  xt = jnp.concatenate([xa_ref[0], xb_ref[0]], axis=0)          # (TH+1, W+1, Cin)

  acc_t = jnp.zeros((C4, TH * W), jnp.float32)
  for si in (0, 1):
    for sj in (0, 1):
      xs = xt[si:si + TH, sj:sj + W, :].reshape(TH * W, Cin)
      # (C4, Cin) . (TH*W, Cin)^T -> (C4, TH*W)  (MXU "NT" matmul, f32 accumulate)
      acc_t = acc_t + lax.dot_general(
          wt_ref[2 * si + sj], xs,
          (((1,), (1,)), ((), ())),
          preferred_element_type=jnp.float32)

  z = jnp.maximum(acc_t * sc_ref[...] + sh_ref[...], 0.0)
  o_ref[0] = z.astype(o_ref.dtype)


def _pick_tile_rows(H, W, Cin, Cout, in_itemsize, budget_bytes):
  """Largest legal row tile whose (double-buffered) footprint fits the budget."""
  C4 = 4 * Cout

  def fits(d):
    in_blk = (d + 1) * (W + 1) * Cin * in_itemsize              # xa + halo block
    out_blk = C4 * d * W * 4                                    # pass-2 output block
    temps = 3 * C4 * d * W * 4 + 4 * d * W * Cin * in_itemsize  # acc / z / shift slabs
    return 2 * (in_blk + out_blk) + temps <= budget_bytes

  cands = [d for d in range(1, H + 1)
           if H % d == 0 and ((d * W) % 128 == 0 or d == H) and fits(d)]
  if not cands:
    return H                                                    # always-legal fallback
  multi = [d for d in cands if H // d >= 2]                     # keep >=2 steps if possible
  return max(multi) if multi else max(cands)


def upsampler_block(x_nchw, w_t, bias, gamma, beta, *, eps=1e-3,
                    tile_rows=None, compute_dtype=jnp.float32,
                    vmem_limit_bytes=48 * 1024 * 1024,
                    tile_budget_bytes=8 * 1024 * 1024):
  """Forward pass of UpsamplerBlock.

  x_nchw : (N, Cin, H, W)        input, PyTorch NCHW layout
  w_t    : (Cin, Cout, 3, 3)     ConvTranspose2d weight (PyTorch layout)
  bias   : (Cout,)               ConvTranspose2d bias (cancels under training-mode BN)
  gamma  : (Cout,)  beta:(Cout,) BatchNorm2d affine params
  returns (N, Cout, 2H, 2W) in NCHW.
  """
  N, Cin, H, W = x_nchw.shape
  Cin_w, Cout, KH, KW = w_t.shape
  assert (Cin_w, KH, KW) == (Cin, 3, 3)
  C4 = 4 * Cout
  Wp = W + 1
  del bias  # cancels exactly: BN subtracts the batch mean of (conv_out + bias).

  # ---- tile selection: TH input rows -> 2*TH output rows per grid step ----
  if tile_rows is None:
    tile_rows = _pick_tile_rows(H, W, Cin, Cout,
                                jnp.dtype(compute_dtype).itemsize,
                                tile_budget_bytes)
  TH = int(tile_rows)
  assert H % TH == 0 and ((TH * W) % 128 == 0 or TH == H), (H, W, TH)
  NT = H // TH

  # ---- NCHW -> NHWC, pad one zero row/col at bottom/right (output_padding edge) ----
  x = jnp.transpose(x_nchw, (0, 2, 3, 1)).astype(compute_dtype)   # (N, H, W, Cin)
  xpad = jnp.pad(x, ((0, 0), (0, 1), (0, 1), (0, 0)))             # (N, H+1, W+1, Cin)

  # ---- per-shift polyphase weight blocks ----
  # y[n, 2i+di, 2j+dj, c] = sum_{si,sj,cin} x[n, i+si, j+sj, cin]
  #                           * blocks[2si+sj][cin, (2di+dj)*Cout + c]
  # with the (si,sj)->(di,dj) block being the flipped conv tap (kh,kw)=(1-di+2si, 1-dj+2sj).
  w_conv = jnp.transpose(w_t[:, :, ::-1, ::-1], (2, 3, 0, 1)).astype(jnp.float32)
  zero_blk = jnp.zeros((Cin, Cout), jnp.float32)
  blocks = []
  for si in (0, 1):
    for sj in (0, 1):
      cols = []
      for di in (0, 1):
        for dj in (0, 1):
          kh = 1 - di + 2 * si
          kw = 1 - dj + 2 * sj
          cols.append(w_conv[kh, kw] if (0 <= kh < KH and 0 <= kw < KW)
                      else zero_blk)
      blocks.append(jnp.concatenate(cols, axis=1))                # (Cin, 4*Cout)
  w_shift = jnp.stack(blocks, axis=0).astype(compute_dtype)       # (4, Cin, 4*Cout)
  w_shift_t = jnp.stack([b.T for b in blocks], axis=0).astype(compute_dtype)

  cparams = pltpu.CompilerParams(
      dimension_semantics=("parallel", "parallel"),
      vmem_limit_bytes=vmem_limit_bytes)

  # ---- pass 1: stats only (no pre-BN activation written to HBM) ----
  stats = pl.pallas_call(
      functools.partial(_conv_stats_kernel, TH=TH, W=W, Cin=Cin, Cout=Cout),
      grid=(N, NT),
      in_specs=[
          pl.BlockSpec((1, TH, Wp, Cin), lambda n, i: (n, i, 0, 0)),
          pl.BlockSpec((1, 1, Wp, Cin), lambda n, i: (n, i * TH + TH, 0, 0)),
          pl.BlockSpec((4, Cin, C4), lambda n, i: (0, 0, 0)),
      ],
      out_specs=pl.BlockSpec((1, 2, C4), lambda n, i: (n * NT + i, 0, 0)),
      out_shape=jax.ShapeDtypeStruct((N * NT, 2, C4), jnp.float32),
      compiler_params=cparams,
  )(xpad, xpad, w_shift)

  # ---- global BN statistics (tiny per-channel reduction, glue code) ----
  # NOTE: E[y^2]-E[y]^2 in f32; the conv bias is excluded so the activations are
  # near zero-mean and cancellation is mild at these sizes.
  s = jnp.sum(stats, axis=0)                               # (2, 4*Cout)
  s1 = jnp.sum(s[0].reshape(4, Cout), axis=0)              # (Cout,)
  s2 = jnp.sum(s[1].reshape(4, Cout), axis=0)
  cnt = float(N * (2 * H) * (2 * W))
  mean_nb = s1 / cnt                                       # mean of y - bias
  var = jnp.maximum(s2 / cnt - mean_nb * mean_nb, 0.0)     # biased batch variance
  inv = lax.rsqrt(var + eps)
  scale = gamma.astype(jnp.float32) * inv
  shift = beta.astype(jnp.float32) - mean_nb * scale       # bias cancelled analytically
  sc_col = jnp.tile(scale, 4).reshape(C4, 1)
  sh_col = jnp.tile(shift, 4).reshape(C4, 1)

  # ---- pass 2: recompute conv (cheap: Cin << 4*Cout), fused BN + ReLU, single
  #      lane-dense store of the final activation ----
  out_t = pl.pallas_call(
      functools.partial(_conv_bn_relu_kernel, TH=TH, W=W, Cin=Cin, Cout=Cout),
      grid=(N, NT),
      in_specs=[
          pl.BlockSpec((1, TH, Wp, Cin), lambda n, i: (n, i, 0, 0)),
          pl.BlockSpec((1, 1, Wp, Cin), lambda n, i: (n, i * TH + TH, 0, 0)),
          pl.BlockSpec((4, C4, Cin), lambda n, i: (0, 0, 0)),
          pl.BlockSpec((C4, 1), lambda n, i: (0, 0)),
          pl.BlockSpec((C4, 1), lambda n, i: (0, 0)),
      ],
      out_specs=pl.BlockSpec((1, C4, TH * W), lambda n, i: (n, 0, i)),
      out_shape=jax.ShapeDtypeStruct((N, C4, H * W), jnp.float32),
      compiler_params=cparams,
  )(xpad, xpad, w_shift_t, sc_col, sh_col)

  # ---- depth-to-space + NCHW (single XLA permute; required by the PyTorch layout) ----
  out6 = out_t.reshape(N, 2, 2, Cout, H, W)                # (n, di, dj, c, i, j)
  out = jnp.transpose(out6, (0, 3, 4, 1, 5, 2)).reshape(N, Cout, 2 * H, 2 * W)
  return out


def _reference(x_nchw, w_t, bias, gamma, beta, eps=1e-3):
  """Pure-JAX reference (independent path via lax.conv_general_dilated)."""
  Cin, Cout, KH, KW = w_t.shape
  w_oihw = jnp.transpose(w_t[:, :, ::-1, ::-1], (1, 0, 2, 3))  # (Cout,Cin,KH,KW)
  y = lax.conv_general_dilated(
      x_nchw, w_oihw, window_strides=(1, 1),
      padding=[(1, 2), (1, 2)], lhs_dilation=(2, 2),
      dimension_numbers=('NCHW', 'OIHW', 'NCHW'))
  y = y + bias.reshape(1, Cout, 1, 1)
  mean = jnp.mean(y, axis=(0, 2, 3), keepdims=True)
  var = jnp.mean((y - mean) ** 2, axis=(0, 2, 3), keepdims=True)
  y = (y - mean) * lax.rsqrt(var + eps)
  y = y * gamma.reshape(1, Cout, 1, 1) + beta.reshape(1, Cout, 1, 1)
  return jnp.maximum(y, 0.0)


if __name__ == "__main__":
  key = jax.random.PRNGKey(0)
  k_x, k_w, k_b, k_g, k_be = jax.random.split(key, 5)

  N, Cin, Cout, H, W = 2, 4, 8, 16, 16
  x = jax.random.normal(k_x, (N, Cin, H, W), jnp.float32)
  # ConvTranspose2d weight layout: (in_channels, out_channels, KH, KW)
  w_t = 0.2 * jax.random.normal(k_w, (Cin, Cout, 3, 3), jnp.float32)
  bias = 0.1 * jax.random.normal(k_b, (Cout,), jnp.float32)
  gamma = 1.0 + 0.1 * jax.random.normal(k_g, (Cout,), jnp.float32)
  beta = 0.1 * jax.random.normal(k_be, (Cout,), jnp.float32)

  ref = _reference(x, w_t, bias, gamma, beta)

  # f32 path with an explicit multi-tile split (exercises the halo-row BlockSpec).
  fn_tiled = jax.jit(functools.partial(upsampler_block, tile_rows=8))
  out = jax.block_until_ready(fn_tiled(x, w_t, bias, gamma, beta))
  assert out.shape == (N, Cout, 2 * H, 2 * W), out.shape
  assert jnp.allclose(out, ref, atol=2e-3, rtol=2e-3), \
      float(jnp.max(jnp.abs(out - ref)))

  # f32 path with the auto tile-size heuristic.
  fn_auto = jax.jit(upsampler_block)
  out2 = jax.block_until_ready(fn_auto(x, w_t, bias, gamma, beta))
  assert jnp.allclose(out2, ref, atol=2e-3, rtol=2e-3), \
      float(jnp.max(jnp.abs(out2 - ref)))

  # bf16 MXU-operand path (f32 accumulation / BN math) — recommended on v6e/v7x.
  fn_bf16 = jax.jit(functools.partial(upsampler_block, compute_dtype=jnp.bfloat16))
  out3 = jax.block_until_ready(fn_bf16(x, w_t, bias, gamma, beta))
  assert jnp.allclose(out3, ref, atol=5e-2, rtol=5e-2), \
      float(jnp.max(jnp.abs(out3 - ref)))

  print("KERNEL_OK")
</pallas_src>

<mosaic_0001>
module attributes {stable_mosaic.version = 11 : i64} {
  func.func @_conv_stats_kernel(%arg0: i32, %arg1: i32, %arg2: memref<1x8x17x4xf32, #tpu.memory_space<vmem>>, %arg3: memref<1x1x17x4xf32, #tpu.memory_space<vmem>>, %arg4: memref<4x4x32xf32, #tpu.memory_space<vmem>>, %arg5: memref<1x2x32xf32, #tpu.memory_space<vmem>>) attributes {dimension_semantics = [#tpu.dimension_semantics<parallel>, #tpu.dimension_semantics<parallel>], iteration_bounds = array<i64: 2, 2>, scalar_prefetch = 0 : i64, scratch_operands = 0 : i64, tpu.core_type = #tpu.core_type<tc>, window_params = [{transform_indices = @transform_0, window_bounds = array<i64: 1, 8, 17, 4>}, {transform_indices = @transform_1, window_bounds = array<i64: 1, 1, 17, 4>}, {pipeline_mode = #tpu.pipeline_mode<synchronous>, transform_indices = @transform_2, window_bounds = array<i64: 4, 4, 32>}, {transform_indices = @transform_3, window_bounds = array<i64: 1, 2, 32>}]} {
    %c0 = arith.constant 0 : index
    %c0_0 = arith.constant 0 : index
    %c0_1 = arith.constant 0 : index
    %c0_2 = arith.constant 0 : index
    %0 = vector.load %arg2[%c0, %c0_0, %c0_1, %c0_2] : memref<1x8x17x4xf32, #tpu.memory_space<vmem>>, vector<1x8x17x4xf32>
    %1 = vector.shape_cast %0 : vector<1x8x17x4xf32> to vector<8x17x4xf32>
    %c0_3 = arith.constant 0 : index
    %c0_4 = arith.constant 0 : index
    %c0_5 = arith.constant 0 : index
    %c0_6 = arith.constant 0 : index
    %2 = vector.load %arg3[%c0_3, %c0_4, %c0_5, %c0_6] : memref<1x1x17x4xf32, #tpu.memory_space<vmem>>, vector<1x1x17x4xf32>
    %3 = vector.shape_cast %2 : vector<1x1x17x4xf32> to vector<1x17x4xf32>
    %4 = tpu.concatenate %1, %3 in 0 : vector<8x17x4xf32>, vector<1x17x4xf32> -> vector<9x17x4xf32>
    %cst = arith.constant 0.000000e+00 : f32
    %5 = vector.broadcast %cst : f32 to vector<128x32xf32>
    %6 = vector.extract_strided_slice %4 {offsets = [0, 0, 0], sizes = [8, 16, 4], strides = [1, 1, 1]} : vector<9x17x4xf32> to vector<8x16x4xf32>
    %7 = vector.shape_cast %6 : vector<8x16x4xf32> to vector<128x4xf32>
    %c0_7 = arith.constant 0 : index
    %c0_8 = arith.constant 0 : index
    %c0_9 = arith.constant 0 : index
    %8 = vector.load %arg4[%c0_7, %c0_8, %c0_9] : memref<4x4x32xf32, #tpu.memory_space<vmem>>, vector<1x4x32xf32>
    %9 = vector.shape_cast %8 : vector<1x4x32xf32> to vector<4x32xf32>
    %cst_10 = arith.constant dense<0.000000e+00> : vector<128x32xf32>
    %10 = tpu.matmul %7, %9, %cst_10 {dimension_numbers = #tpu.dot_dimension_numbers<[1], [0], [0], [1], [0, 0, 1, 1], [], []>} : vector<128x4xf32>, vector<4x32xf32>, vector<128x32xf32> -> vector<128x32xf32>
    %11 = arith.addf %5, %10 : vector<128x32xf32>
    %12 = vector.extract_strided_slice %4 {offsets = [0, 1, 0], sizes = [8, 16, 4], strides = [1, 1, 1]} : vector<9x17x4xf32> to vector<8x16x4xf32>
    %13 = vector.shape_cast %12 : vector<8x16x4xf32> to vector<128x4xf32>
    %c1 = arith.constant 1 : index
    %c0_11 = arith.constant 0 : index
    %c0_12 = arith.constant 0 : index
    %14 = vector.load %arg4[%c1, %c0_11, %c0_12] : memref<4x4x32xf32, #tpu.memory_space<vmem>>, vector<1x4x32xf32>
    %15 = vector.shape_cast %14 : vector<1x4x32xf32> to vector<4x32xf32>
    %cst_13 = arith.constant dense<0.000000e+00> : vector<128x32xf32>
    %16 = tpu.matmul %13, %15, %cst_13 {dimension_numbers = #tpu.dot_dimension_numbers<[1], [0], [0], [1], [0, 0, 1, 1], [], []>} : vector<128x4xf32>, vector<4x32xf32>, vector<128x32xf32> -> vector<128x32xf32>
    %17 = arith.addf %11, %16 : vector<128x32xf32>
    %18 = vector.extract_strided_slice %4 {offsets = [1, 0, 0], sizes = [8, 16, 4], strides = [1, 1, 1]} : vector<9x17x4xf32> to vector<8x16x4xf32>
    %19 = vector.shape_cast %18 : vector<8x16x4xf32> to vector<128x4xf32>
    %c2 = arith.constant 2 : index
    %c0_14 = arith.constant 0 : index
    %c0_15 = arith.constant 0 : index
    %20 = vector.load %arg4[%c2, %c0_14, %c0_15] : memref<4x4x32xf32, #tpu.memory_space<vmem>>, vector<1x4x32xf32>
    %21 = vector.shape_cast %20 : vector<1x4x32xf32> to vector<4x32xf32>
    %cst_16 = arith.constant dense<0.000000e+00> : vector<128x32xf32>
    %22 = tpu.matmul %19, %21, %cst_16 {dimension_numbers = #tpu.dot_dimension_numbers<[1], [0], [0], [1], [0, 0, 1, 1], [], []>} : vector<128x4xf32>, vector<4x32xf32>, vector<128x32xf32> -> vector<128x32xf32>
    %23 = arith.addf %17, %22 : vector<128x32xf32>
    %24 = vector.extract_strided_slice %4 {offsets = [1, 1, 0], sizes = [8, 16, 4], strides = [1, 1, 1]} : vector<9x17x4xf32> to vector<8x16x4xf32>
    %25 = vector.shape_cast %24 : vector<8x16x4xf32> to vector<128x4xf32>
    %c3 = arith.constant 3 : index
    %c0_17 = arith.constant 0 : index
    %c0_18 = arith.constant 0 : index
    %26 = vector.load %arg4[%c3, %c0_17, %c0_18] : memref<4x4x32xf32, #tpu.memory_space<vmem>>, vector<1x4x32xf32>
    %27 = vector.shape_cast %26 : vector<1x4x32xf32> to vector<4x32xf32>
    %cst_19 = arith.constant dense<0.000000e+00> : vector<128x32xf32>
    %28 = tpu.matmul %25, %27, %cst_19 {dimension_numbers = #tpu.dot_dimension_numbers<[1], [0], [0], [1], [0, 0, 1, 1], [], []>} : vector<128x4xf32>, vector<4x32xf32>, vector<128x32xf32> -> vector<128x32xf32>
    %29 = arith.addf %23, %28 : vector<128x32xf32>
    %cst_20 = arith.constant dense<0.000000e+00> : vector<32xf32>
    %30 = vector.multi_reduction <add>, %29, %cst_20 [0] : vector<128x32xf32> to vector<32xf32>
    %31 = vector.shape_cast %30 : vector<32xf32> to vector<1x32xf32>
    %32 = arith.mulf %29, %29 : vector<128x32xf32>
    %cst_21 = arith.constant dense<0.000000e+00> : vector<32xf32>
    %33 = vector.multi_reduction <add>, %32, %cst_21 [0] : vector<128x32xf32> to vector<32xf32>
    %34 = vector.shape_cast %33 : vector<32xf32> to vector<1x32xf32>
    %35 = tpu.concatenate %31, %34 in 0 : vector<1x32xf32>, vector<1x32xf32> -> vector<2x32xf32>
    %c0_22 = arith.constant 0 : index
    %c0_23 = arith.constant 0 : index
    %c0_24 = arith.constant 0 : index
    %36 = vector.load %arg5[%c0_22, %c0_23, %c0_24] : memref<1x2x32xf32, #tpu.memory_space<vmem>>, vector<1x2x32xf32>
    %37 = vector.shape_cast %36 : vector<1x2x32xf32> to vector<2x32xf32>
    %38 = vector.shape_cast %35 : vector<2x32xf32> to vector<1x2x32xf32>
    tpu.vector_store %arg5[%c0_22, %c0_23, %c0_24], %38 {strides = array<i32>} : memref<1x2x32xf32, #tpu.memory_space<vmem>>, vector<1x2x32xf32>,
    return
  }
  func.func @transform_0(%arg0: i32, %arg1: i32) -> (i32, i32, i32, i32) {
    %c0_i32 = arith.constant 0 : i32
    %c0_i32_0 = arith.constant 0 : i32
    %c0_i32_1 = arith.constant 0 : i32
    return %arg0, %arg1, %c0_i32, %c0_i32_0 : i32, i32, i32, i32
  }
  func.func @transform_1(%arg0: i32, %arg1: i32) -> (i32, i32, i32, i32) {
    %c8_i32 = arith.constant 8 : i32
    %0 = arith.muli %arg1, %c8_i32 : i32
    %c8_i32_0 = arith.constant 8 : i32
    %1 = arith.addi %0, %c8_i32_0 : i32
    %c0_i32 = arith.constant 0 : i32
    %c0_i32_1 = arith.constant 0 : i32
    %c0_i32_2 = arith.constant 0 : i32
    return %arg0, %1, %c0_i32, %c0_i32_1 : i32, i32, i32, i32
  }
  func.func @transform_2(%arg0: i32, %arg1: i32) -> (i32, i32, i32) {
    %c0_i32 = arith.constant 0 : i32
    %c0_i32_0 = arith.constant 0 : i32
    %c0_i32_1 = arith.constant 0 : i32
    %c0_i32_2 = arith.constant 0 : i32
    return %c0_i32, %c0_i32_0, %c0_i32_1 : i32, i32, i32
  }
  func.func @transform_3(%arg0: i32, %arg1: i32) -> (i32, i32, i32) {
    %c2_i32 = arith.constant 2 : i32
    %0 = arith.muli %arg0, %c2_i32 : i32
    %1 = arith.addi %0, %arg1 : i32
    %c0_i32 = arith.constant 0 : i32
    %c0_i32_0 = arith.constant 0 : i32
    %c0_i32_1 = arith.constant 0 : i32
    return %1, %c0_i32, %c0_i32_0 : i32, i32, i32
  }
}

module attributes {stable_mosaic.version = 11 : i64} {
  func.func @_conv_bn_relu_kernel(%arg0: i32, %arg1: i32, %arg2: memref<1x8x17x4xf32, #tpu.memory_space<vmem>>, %arg3: memref<1x1x17x4xf32, #tpu.memory_space<vmem>>, %arg4: memref<4x32x4xf32, #tpu.memory_space<vmem>>, %arg5: memref<32x1xf32, #tpu.memory_space<vmem>>, %arg6: memref<32x1xf32, #tpu.memory_space<vmem>>, %arg7: memref<1x32x128xf32, #tpu.memory_space<vmem>>) attributes {dimension_semantics = [#tpu.dimension_semantics<parallel>, #tpu.dimension_semantics<parallel>], iteration_bounds = array<i64: 2, 2>, scalar_prefetch = 0 : i64, scratch_operands = 0 : i64, tpu.core_type = #tpu.core_type<tc>, window_params = [{transform_indices = @transform_0, window_bounds = array<i64: 1, 8, 17, 4>}, {transform_indices = @transform_1, window_bounds = array<i64: 1, 1, 17, 4>}, {pipeline_mode = #tpu.pipeline_mode<synchronous>, transform_indices = @transform_2, window_bounds = array<i64: 4, 32, 4>}, {pipeline_mode = #tpu.pipeline_mode<synchronous>, transform_indices = @transform_3, window_bounds = array<i64: 32, 1>}, {pipeline_mode = #tpu.pipeline_mode<synchronous>, transform_indices = @transform_4, window_bounds = array<i64: 32, 1>}, {transform_indices = @transform_5, window_bounds = array<i64: 1, 32, 128>}]} {
    %c0 = arith.constant 0 : index
    %c0_0 = arith.constant 0 : index
    %c0_1 = arith.constant 0 : index
    %c0_2 = arith.constant 0 : index
    %0 = vector.load %arg2[%c0, %c0_0, %c0_1, %c0_2] : memref<1x8x17x4xf32, #tpu.memory_space<vmem>>, vector<1x8x17x4xf32>
    %1 = vector.shape_cast %0 : vector<1x8x17x4xf32> to vector<8x17x4xf32>
    %c0_3 = arith.constant 0 : index
    %c0_4 = arith.constant 0 : index
    %c0_5 = arith.constant 0 : index
    %c0_6 = arith.constant 0 : index
    %2 = vector.load %arg3[%c0_3, %c0_4, %c0_5, %c0_6] : memref<1x1x17x4xf32, #tpu.memory_space<vmem>>, vector<1x1x17x4xf32>
    %3 = vector.shape_cast %2 : vector<1x1x17x4xf32> to vector<1x17x4xf32>
    %4 = tpu.concatenate %1, %3 in 0 : vector<8x17x4xf32>, vector<1x17x4xf32> -> vector<9x17x4xf32>
    %cst = arith.constant 0.000000e+00 : f32
    %5 = vector.broadcast %cst : f32 to vector<32x128xf32>
    %6 = vector.extract_strided_slice %4 {offsets = [0, 0, 0], sizes = [8, 16, 4], strides = [1, 1, 1]} : vector<9x17x4xf32> to vector<8x16x4xf32>
    %7 = vector.shape_cast %6 : vector<8x16x4xf32> to vector<128x4xf32>
    %c0_7 = arith.constant 0 : index
    %c0_8 = arith.constant 0 : index
    %c0_9 = arith.constant 0 : index
    %8 = vector.load %arg4[%c0_7, %c0_8, %c0_9] : memref<4x32x4xf32, #tpu.memory_space<vmem>>, vector<1x32x4xf32>
    %9 = vector.shape_cast %8 : vector<1x32x4xf32> to vector<32x4xf32>
    %cst_10 = arith.constant dense<0.000000e+00> : vector<32x128xf32>
    %10 = tpu.matmul %9, %7, %cst_10 {dimension_numbers = #tpu.dot_dimension_numbers<[1], [1], [0], [0], [0, 0, 1, 0], [], []>} : vector<32x4xf32>, vector<128x4xf32>, vector<32x128xf32> -> vector<32x128xf32>
    %11 = arith.addf %5, %10 : vector<32x128xf32>
    %12 = vector.extract_strided_slice %4 {offsets = [0, 1, 0], sizes = [8, 16, 4], strides = [1, 1, 1]} : vector<9x17x4xf32> to vector<8x16x4xf32>
    %13 = vector.shape_cast %12 : vector<8x16x4xf32> to vector<128x4xf32>
    %c1 = arith.constant 1 : index
    %c0_11 = arith.constant 0 : index
    %c0_12 = arith.constant 0 : index
    %14 = vector.load %arg4[%c1, %c0_11, %c0_12] : memref<4x32x4xf32, #tpu.memory_space<vmem>>, vector<1x32x4xf32>
    %15 = vector.shape_cast %14 : vector<1x32x4xf32> to vector<32x4xf32>
    %cst_13 = arith.constant dense<0.000000e+00> : vector<32x128xf32>
    %16 = tpu.matmul %15, %13, %cst_13 {dimension_numbers = #tpu.dot_dimension_numbers<[1], [1], [0], [0], [0, 0, 1, 0], [], []>} : vector<32x4xf32>, vector<128x4xf32>, vector<32x128xf32> -> vector<32x128xf32>
    %17 = arith.addf %11, %16 : vector<32x128xf32>
    %18 = vector.extract_strided_slice %4 {offsets = [1, 0, 0], sizes = [8, 16, 4], strides = [1, 1, 1]} : vector<9x17x4xf32> to vector<8x16x4xf32>
    %19 = vector.shape_cast %18 : vector<8x16x4xf32> to vector<128x4xf32>
    %c2 = arith.constant 2 : index
    %c0_14 = arith.constant 0 : index
    %c0_15 = arith.constant 0 : index
    %20 = vector.load %arg4[%c2, %c0_14, %c0_15] : memref<4x32x4xf32, #tpu.memory_space<vmem>>, vector<1x32x4xf32>
    %21 = vector.shape_cast %20 : vector<1x32x4xf32> to vector<32x4xf32>
    %cst_16 = arith.constant dense<0.000000e+00> : vector<32x128xf32>
    %22 = tpu.matmul %21, %19, %cst_16 {dimension_numbers = #tpu.dot_dimension_numbers<[1], [1], [0], [0], [0, 0, 1, 0], [], []>} : vector<32x4xf32>, vector<128x4xf32>, vector<32x128xf32> -> vector<32x128xf32>
    %23 = arith.addf %17, %22 : vector<32x128xf32>
    %24 = vector.extract_strided_slice %4 {offsets = [1, 1, 0], sizes = [8, 16, 4], strides = [1, 1, 1]} : vector<9x17x4xf32> to vector<8x16x4xf32>
    %25 = vector.shape_cast %24 : vector<8x16x4xf32> to vector<128x4xf32>
    %c3 = arith.constant 3 : index
    %c0_17 = arith.constant 0 : index
    %c0_18 = arith.constant 0 : index
    %26 = vector.load %arg4[%c3, %c0_17, %c0_18] : memref<4x32x4xf32, #tpu.memory_space<vmem>>, vector<1x32x4xf32>
    %27 = vector.shape_cast %26 : vector<1x32x4xf32> to vector<32x4xf32>
    %cst_19 = arith.constant dense<0.000000e+00> : vector<32x128xf32>
    %28 = tpu.matmul %27, %25, %cst_19 {dimension_numbers = #tpu.dot_dimension_numbers<[1], [1], [0], [0], [0, 0, 1, 0], [], []>} : vector<32x4xf32>, vector<128x4xf32>, vector<32x128xf32> -> vector<32x128xf32>
    %29 = arith.addf %23, %28 : vector<32x128xf32>
    %c0_20 = arith.constant 0 : index
    %c0_21 = arith.constant 0 : index
    %30 = vector.load %arg5[%c0_20, %c0_21] : memref<32x1xf32, #tpu.memory_space<vmem>>, vector<32x1xf32>
    %31 = vector.broadcast %30 : vector<32x1xf32> to vector<32x128xf32>
    %32 = arith.mulf %29, %31 : vector<32x128xf32>
    %c0_22 = arith.constant 0 : index
    %c0_23 = arith.constant 0 : index
    %33 = vector.load %arg6[%c0_22, %c0_23] : memref<32x1xf32, #tpu.memory_space<vmem>>, vector<32x1xf32>
    %34 = vector.broadcast %33 : vector<32x1xf32> to vector<32x128xf32>
    %35 = arith.addf %32, %34 : vector<32x128xf32>
    %cst_24 = arith.constant 0.000000e+00 : f32
    %36 = vector.broadcast %cst_24 : f32 to vector<32x128xf32>
    %37 = arith.maximumf %35, %36 : vector<32x128xf32>
    %c0_25 = arith.constant 0 : index
    %c0_26 = arith.constant 0 : index
    %c0_27 = arith.constant 0 : index
    %38 = vector.load %arg7[%c0_25, %c0_26, %c0_27] : memref<1x32x128xf32, #tpu.memory_space<vmem>>, vector<1x32x128xf32>
    %39 = vector.shape_cast %38 : vector<1x32x128xf32> to vector<32x128xf32>
    %40 = vector.shape_cast %37 : vector<32x128xf32> to vector<1x32x128xf32>
    tpu.vector_store %arg7[%c0_25, %c0_26, %c0_27], %40 {strides = array<i32>} : memref<1x32x128xf32, #tpu.memory_space<vmem>>, vector<1x32x128xf32>,
    return
  }
  func.func @transform_0(%arg0: i32, %arg1: i32) -> (i32, i32, i32, i32) {
    %c0_i32 = arith.constant 0 : i32
    %c0_i32_0 = arith.constant 0 : i32
    %c0_i32_1 = arith.constant 0 : i32
    return %arg0, %arg1, %c0_i32, %c0_i32_0 : i32, i32, i32, i32
  }
  func.func @transform_1(%arg0: i32, %arg1: i32) -> (i32, i32, i32, i32) {
    %c8_i32 = arith.constant 8 : i32
    %0 = arith.muli %arg1, %c8_i32 : i32
    %c8_i32_0 = arith.constant 8 : i32
    %1 = arith.addi %0, %c8_i32_0 : i32
    %c0_i32 = arith.constant 0 : i32
    %c0_i32_1 = arith.constant 0 : i32
    %c0_i32_2 = arith.constant 0 : i32
    return %arg0, %1, %c0_i32, %c0_i32_1 : i32, i32, i32, i32
  }
  func.func @transform_2(%arg0: i32, %arg1: i32) -> (i32, i32, i32) {
    %c0_i32 = arith.constant 0 : i32
    %c0_i32_0 = arith.constant 0 : i32
    %c0_i32_1 = arith.constant 0 : i32
    %c0_i32_2 = arith.constant 0 : i32
    return %c0_i32, %c0_i32_0, %c0_i32_1 : i32, i32, i32
  }
  func.func @transform_3(%arg0: i32, %arg1: i32) -> (i32, i32) {
    %c0_i32 = arith.constant 0 : i32
    %c0_i32_0 = arith.constant 0 : i32
    %c0_i32_1 = arith.constant 0 : i32
    return %c0_i32, %c0_i32_0 : i32, i32
  }
  func.func @transform_4(%arg0: i32, %arg1: i32) -> (i32, i32) {
    %c0_i32 = arith.constant 0 : i32
    %c0_i32_0 = arith.constant 0 : i32
    %c0_i32_1 = arith.constant 0 : i32
    return %c0_i32, %c0_i32_0 : i32, i32
  }
  func.func @transform_5(%arg0: i32, %arg1: i32) -> (i32, i32, i32) {
    %c0_i32 = arith.constant 0 : i32
    %c0_i32_0 = arith.constant 0 : i32
    return %arg0, %c0_i32, %arg1 : i32, i32, i32
  }
}

</mosaic_0001>

<bundles_post_ra>
// kernel: squeeze.20
= control target key start
LH: loop header
LB: loop body
LE: loop exit
PB: predicated region body
PF: predicated region fallthrough
CT: control target
= control target key end

     0   :  { %s37_s8 = smov 104   ;;  %vm7_vm0 = vcmask 64512   ;;  %s38_s9 = smov 112   ;;  %s55_s0 = inlined_call_operand.vmem [shape: f32[32], index: 0, kind: input, shape index: {}]   ;;  %s56_s1 = inlined_call_operand.vmem [shape: f32[4,8], index: 1, kind: output, shape index: {}]  }
   0x1   :  { %v4_v0 = vld [vmem:[%s55_s0] sm:$0x1]  ;;  %s36_s0 = smov 120  }
   0x2   :  { %5 = vst [vmem:[#allocation1] sm:$0x1] %v4_v0 }
   0x9   :  { %v9_v1 = vld [vmem:[#allocation1] sm:$0x1]  }
   0xa   :  { %v21_v2 = vld [vmem:[#allocation1] sm:$0x1]   ;;  %10 = vrot.lane.b32.xlu0 %v9_v1, %s36_s0 }
   0xb   :  { %22 = vrot.lane.b32.xlu1 %v21_v2, %s37_s8  ;;  %v6_v3 = vld [vmem:[#allocation1] sm:$0x1]  }
   0xc   :  { %v15_v4 = vld [vmem:[#allocation1] sm:$0x1]   ;;  %8 = vst.msk [vmem:[#allocation0] sm:$0x1] %vm7_vm0, %v6_v3  }
   0xe   :  { %16 = vrot.lane.b32.xlu0 %v15_v4, %s38_s9 }
  0x7c   :  { %v11_v5 = vpop.permute.xlu0 %10  }
  0x7d   :  { %v23_v6 = vpop.permute.xlu1 %22   ;;  %14 = vst.msk [vmem:[#allocation0 + $0x1] sm:$0x1] %vm7_vm0, %v11_v5  }
  0x7e   :  { %26 = vst.msk [vmem:[#allocation0 + $0x3] sm:$0x1] %vm7_vm0, %v23_v6  }
  0x80   :  { %v17_v7 = vpop.permute.xlu0 %16  }
  0x81   :  { %20 = vst.msk [vmem:[#allocation0 + $0x2] sm:$0x1] %vm7_vm0, %v17_v7  }
  0x88   :  { %v30_v8 = vld [vmem:[#allocation0] sm:$0xf] }
  0x89   :  { %32 = vst [vmem:[%s56_s1] sm:$0xf] %v30_v8 }

// kernel: tile.18
= control target key start
LH: loop header
LB: loop body
LE: loop exit
PB: predicated region body
PF: predicated region fallthrough
CT: control target
= control target key end

     0   :  { %s22_s0 = inlined_call_operand.vmem [shape: f32[8], index: 0, kind: input, shape index: {}]   ;;  %s23_s1 = inlined_call_operand.vmem [shape: f32[4,8], index: 1, kind: output, shape index: {}]  }
   0x1   :  { %v4_v0 = vld [vmem:[%s22_s0] ss:$0 sm:$0xff] }
   0x2   :  { %5 = vst [vmem:[%s23_s1] sm:$0xf] %v4_v0 }

// kernel: tile.0
= control target key start
LH: loop header
LB: loop body
LE: loop exit
PB: predicated region body
PF: predicated region fallthrough
CT: control target
= control target key end

     0   :  { %s66_s8 = smov 125   ;;  %vm7_vm0 = vcmask 7168   ;;  %s67_s11 = smov 126   ;;  %s117_s0 = inlined_call_operand.vmem [shape: f32[4,8], index: 0, kind: input, shape index: {}]   ;;  %s118_s1 = inlined_call_operand.vmem [shape: f32[32,1], index: 1, kind: output, shape index: {}]  }
   0x1   :  { %v4_v0 = vld [vmem:[%s117_s0] sm:$0xf]  ;;  %s65_s0 = smov 127   ;;  %s68_s12 = smov 124  }
   0x2   :  { %5 = vst [vmem:[#allocation0] sm:$0xf] %v4_v0  ;;  %s69_s13 = smov 123   ;;  %s70_s14 = smov 122  }
   0x3   :  { %s71_s15 = smov 121  }
   0x9   :  { %v9_v1 = vld [vmem:[#allocation0] sm:$0xf]  }
   0xa   :  { %v21_v2 = vld [vmem:[#allocation0] sm:$0xf]   ;;  %10 = vrot.lane.b32.xlu0 %v9_v1, %s65_s0 }
   0xb   :  { %22 = vrot.lane.b32.xlu1 %v21_v2, %s66_s8  ;;  %v15_v3 = vld [vmem:[#allocation0] sm:$0xf]  }
   0xc   :  { %v27_v4 = vld [vmem:[#allocation0] sm:$0xf]  }
   0xd   :  { %v6_v5 = vld [vmem:[#allocation0] sm:$0xf]  }
   0xe   :  { %8 = vst.msk [vmem:[%s118_s1] ss:$8 sm:$0xf] %vm7_vm0, %v6_v5   ;;  %16 = vrot.lane.b32.xlu0 %v15_v3, %s67_s11  ;;  %v33_v6 = vld [vmem:[#allocation0] sm:$0xf]  }
   0xf   :  { %28 = vrot.lane.b32.xlu1 %v27_v4, %s68_s12  ;;  %v39_v7 = vld [vmem:[#allocation0] sm:$0xf]  }
  0x10   :  { %v45_v8 = vld [vmem:[#allocation0] sm:$0xf]  }
  0x12   :  { %34 = vrot.lane.b32.xlu0 %v33_v6, %s69_s13 }
  0x13   :  { %40 = vrot.lane.b32.xlu1 %v39_v7, %s70_s14 }
  0x16   :  { %46 = vrot.lane.b32.xlu0 %v45_v8, %s71_s15 }
  0x7c   :  { %v11_v9 = vpop.permute.xlu0 %10  }
  0x7d   :  { %v23_v10 = vpop.permute.xlu1 %22   ;;  %51 = vst.msk [vmem:[%s118_s1 + $0x1] ss:$8 sm:$0xf] %vm7_vm0, %v11_v9  }
  0x7e   :  { %53 = vst.msk [vmem:[%s118_s1 + $0x3] ss:$8 sm:$0xf] %vm7_vm0, %v23_v10  }
  0x80   :  { %v17_v11 = vpop.permute.xlu0 %16  }
  0x81   :  { %v29_v12 = vpop.permute.xlu1 %28   ;;  %52 = vst.msk [vmem:[%s118_s1 + $0x2] ss:$8 sm:$0xf] %vm7_vm0, %v17_v11  }
  0x82   :  { %54 = vst.msk [vmem:[%s118_s1 + $0x4] ss:$8 sm:$0xf] %vm7_vm0, %v29_v12  }
  0x84   :  { %v35_v13 = vpop.permute.xlu0 %34  }
  0x85   :  { %v41_v14 = vpop.permute.xlu1 %40   ;;  %55 = vst.msk [vmem:[%s118_s1 + $0x5] ss:$8 sm:$0xf] %vm7_vm0, %v35_v13  }
  0x86   :  { %56 = vst.msk [vmem:[%s118_s1 + $0x6] ss:$8 sm:$0xf] %vm7_vm0, %v41_v14  }
  0x88   :  { %v47_v15 = vpop.permute.xlu0 %46  }
  0x89   :  { %57 = vst.msk [vmem:[%s118_s1 + $0x7] ss:$8 sm:$0xf] %vm7_vm0, %v47_v15  }

// kernel: upsampler_block.2
= control target key start
LH: loop header
LB: loop body
LE: loop exit
PB: predicated region body
PF: predicated region fallthrough
CT: control target
= control target key end

     0   :  { %s1695_s12 = smov 0   ;;  %s1697_s13 = smov 0   ;;  %s2034_s0 = inlined_call_operand.vmem [shape: f32[2,17,17,4], index: 0, kind: input, shape index: {}, may-alias: {0,1}]   ;;  %s2035_s1 = inlined_call_operand.vmem [shape: f32[2,17,17,4], index: 1, kind: input, shape index: {}, may-alias: {0,1}]   ;;  %s2036_s2 = inlined_call_operand.vmem [shape: f32[4,4,32], index: 2, kind: input, shape index: {}]   ;;  %s2037_s3 = inlined_call_operand.vmem [shape: f32[4,2,32], index: 3, kind: output, shape index: {}]  }
   0x1   :  { %s1699_s14 = smov 0   ;;  %s1701_s15 = smov 0  }
   0x2   :  { %s1703_s16 = smov 0  }
   0x3 LB: > { %s22_s17 = sadd.s32 1, %s1665_s14  ;;  %s25_s18 = sadd.s32 1, %s1669_s15  ;;  %s1673_s16 = sphi %s1703_s16, %s13_s16   ;;  %s1669_s15 = sphi %s1701_s15, %s2042_s15   ;;  %s1665_s14 = sphi %s1699_s14, %s2041_s14   ;;  %s1661_s13 = sphi %s1697_s13, %s2040_s13   ;;  %s1657_s12 = sphi %s1695_s12, %s2039_s12  }
   0x4   : > { %p23_p0 = scmp.ge.s32.totalorder %s22_s17, 2  ;;  %p1292_p1 = scmp.ge.s32.totalorder %s1673_s16, 1 }
   0x5   : > { %p195_p2 = scmp.lt.s32.totalorder %s1673_s16, 5 }
   0x6   : > { %s2044_s17 = smov (%p23_p0, %s22_s17), 0  ;;  %s2046_s18 = smov (!%p23_p0, %s25_s18), %s1669_s15 }
   0x7   : > { %p196_p3 = pnand %p1292_p1, %p195_p2  ;;  %p27_p4 = scmp.ge.s32.totalorder %s2046_s18, 2 }
   0x8   : > { %vm411_vm0 = vcmask (!%p196_p3), 1043456   ;;  %v1334_v0 = vld [vmem:[%s2036_s2 + $0x8] sm:$0xf] (!%p196_p3)  ;;  %s1733_s21 = sshll.u32 (!%p196_p3), %s1657_s12, 3  ;;  %p247_p5 = scmp.lt.s32.totalorder (!%p196_p3), %s1661_s13, 1  ;;  %vm378_vm1 = vcmask (!%p196_p3), 31744  }
   0x9   : > { %s2048_s18 = smov (%p27_p4, %s2046_s18), 0  ;;  %199 = sbr.rel (%p196_p3) target bundleno = 326 (0x146), region = 32 }
   0xa   : > { %1492 = vmatprep.subr.msk.mxu0 (!%p196_p3), %vm411_vm0, %v1334_v0  ;;  %p249_p6 = scmp.lt.s32.totalorder (!%p196_p3), %s1733_s21, 16  ;;  %v1299_v1 = vld [vmem:[%s2036_s2 + $0x4] sm:$0xf] (!%p196_p3)  ;;  %v310_v2 = vld [vmem:[%s2036_s2] sm:$0xf] (!%p196_p3)  ;;  %vm335_vm2 = vcmask (!%p196_p3), 1046528  }
   0xb   : > { %1493 = vmatpush3.msk.msra.mxu0 (!%p196_p3), %vm411_vm0, %v1334_v0  ;;  %1440 = vmatprep.subr.msk.mxu1 (!%p196_p3), %vm411_vm0, %v1299_v1  ;;  %v1352_v3 = vld [vmem:[%s2036_s2 + $0xc] sm:$0xf] (!%p196_p3)  ;;  %s263_s10 = sadd.s32 (!%p196_p3), 8, %s1733_s21  ;;  %vm1088_vm3 = vcmask (!%p196_p3), 261120   ;;  %s1297_s25 = sshll.u32 (!%p196_p3), %s1661_s13, 1  ;;  %vm1179_vm4 = vcmask (!%p196_p3), 1040384  }
   0xc   : > { %1441 = vmatpush3.msk.msra.mxu1 (!%p196_p3), %vm411_vm0, %v1299_v1  ;;  %1518 = vmatprep.subr.msk.mxu0 (!%p196_p3), %vm411_vm0, %v1352_v3  ;;  %p1799_p7 = scmp.lt.s32.totalorder (!%p196_p3), %s263_s10, 16  ;;  %vm1181_vm5 = vcmask (!%p196_p3), 254976  }
   0xd   : > { %1466 = vmatprep.subr.msk.mxu1 (!%p196_p3), %vm411_vm0, %v310_v2 }
  0x10   : > { %s1746_s26 = scalar_select %p247_p5, %s1661_s13, 1 }
  0x11   : > { %s250_s29 = scalar_select %p249_p6, %s1733_s21, 16 }
  0x12   : > { %s1593_s30 = smul.u32 51, %s1746_s26  ;;  %s2050_s10 = smov (!%p1799_p7, %s263_s10), 16 }
  0x13   : > { %s1592_s4 = smul.u32 3, %s250_s29  ;;  %s276_s26 = sadd.s32 %s1657_s12, %s1297_s25 }
  0x14   : > { %s1594_s19 = smul.u32 3, %s2050_s10  ;;  %p277_p8 = scmp.lt.s32.totalorder %s276_s26, 3 }
  0x15   : > { %s253_s5 = sadd.s32 %s1593_s30, %s1592_s4 }
  0x16   : > { %s1294_s6 = sshll.u32 %s253_s5, 3  ;;  %s270_s20 = sadd.s32 %s1594_s19, %s1593_s30 }
  0x17   : > { %s1762_s9 = scalar_lea.vmem %s2034_s0, %s1294_s6  ;;  %s1296_s21 = sshll.u32 %s270_s20, 3 }
  0x18   : > { %v1765_v4 = vld [vmem:[%s1762_s9 + $0x18] sm:$0xff]  ;;  %v1768_v5 = vld [vmem:[%s1762_s9 + $0x20] sm:$0xff]  ;;  %v1779_v9 = vld [vmem:[%s1762_s9 + $0x8] sm:$0xff]  ;;  %s1902_s24 = scalar_lea.vmem %s2035_s1, %s1296_s21  ;;  %s2052_s26 = smov (!%p277_p8, %s276_s26), 3 }
  0x19   : > { %v1771_v6 = vld [vmem:[%s1762_s9] sm:$0xff]  ;;  %v341_v7 = vrot.slane %v1765_v4, 1  ;;  %1494 = vmatprep.mubr.msk.f32.mxu0 %vm378_vm1, %v1765_v4  ;;  %v342_v8 = vrot.slane %v1768_v5, 1  ;;  %v285_v11 = vld [vmem:[%s1762_s9 + $0x10] sm:$0x1]  ;;  %v337_v12 = vrot.slane %v1779_v9, 1 }
  0x1a   : > { %v336_v10 = vrot.slane %v1771_v6, 1  ;;  %1495 = vmatmul.mubr.msk.f32.vlgmr.msra.gmra.mrb[0].mxu0 %vm378_vm1, %v1768_v5  ;;  %v339_v13 = vrot.slane %v285_v11, 1  ;;  %v1787_v14 = vld [vmem:[%s1762_s9 + $0x30] sm:$0xff]  ;;  %v288_v15 = vld [vmem:[%s1762_s9 + $0x28] sm:$0x1]  ;;  %v1795_v17 = vld [vmem:[%s1762_s9 + $0x38] sm:$0xff] }
  0x1b   : > { %v346_v16 = vrot.slane %v1787_v14, 1  ;;  %1497 = vmatprep.mubr.msk.f32.mxu0 %vm378_vm1, %v1787_v14  ;;  %1519 = vmatpush3.msk.msra.mxu0 %vm411_vm0, %v1352_v3  ;;  %v344_v18 = vrot.slane %v288_v15, 1  ;;  %v347_v21 = vrot.slane %v1795_v17, 1  ;;  %v1807_v22 = vsel %vm335_vm2, %v341_v7, %v342_v8  ;;  %v291_v23 = vld [vmem:[%s1762_s9 + $0x40] sm:$0x1]  ;;  %v1812_v24 = vld [vmem:[%s1762_s9 + $0x48] sm:$0xff] }
  0x1c   : > { %v338_v19 = vsel %vm335_vm2, %v336_v10, %v337_v12  ;;  %v340_v20 = vsel %vm335_vm2, %v337_v12, %v339_v13  ;;  %v1824_v26 = vld [vmem:[%s1762_s9 + $0x50] sm:$0xff]  ;;  %v349_v27 = vrot.slane %v291_v23, 1  ;;  %v351_v28 = vrot.slane %v1812_v24, 1  ;;  %v1838_v31 = vld [vmem:[%s1762_s9 + $0x60] sm:$0xff]  ;;  %v294_v32 = vld [vmem:[%s1762_s9 + $0x58] sm:$0x1] }
  0x1d   : > { %1442 = vmatprep.mubr.msk.f32.mxu1 %vm378_vm1, %v338_v19  ;;  %v1821_v25 = vsel %vm335_vm2, %v342_v8, %v344_v18  ;;  %v352_v29 = vrot.slane %v1824_v26, 1  ;;  %v1835_v30 = vsel %vm335_vm2, %v346_v16, %v347_v21  ;;  %v1853_v34 = vld [vmem:[%s1762_s9 + $0x68] sm:$0xff]  ;;  %v354_v35 = vrot.slane %v294_v32, 1  ;;  %v1859_v39 = vld [vmem:[%s1762_s9 + $0x78] sm:$0xff]  ;;  %v297_v40 = vld [vmem:[%s1762_s9 + $0x70] sm:$0x1] }
  0x1e   : > { %1443 = vmatmul.mubr.msk.f32.vlgmr.msra.gmra.mrb[0].mxu1 %vm378_vm1, %v340_v20  ;;  %1498 = vmatmul.mubr.msk.f32.gmra.mrb[2].mxu0 %vm378_vm1, %v1795_v17  ;;  %v1848_v33 = vsel %vm335_vm2, %v347_v21, %v349_v27  ;;  %v356_v36 = vrot.slane %v1838_v31, 1  ;;  %v357_v37 = vrot.slane %v1853_v34, 1  ;;  %v1871_v42 = vld [vmem:[%s1762_s9 + $0x80] sm:$0xff]  ;;  %v359_v43 = vrot.slane %v297_v40, 1  ;;  %v1879_v47 = vld [vmem:[%s1762_s9 + $0x90] sm:$0xff]  ;;  %v1890_v50 = vld [vmem:[%s1762_s9 + $0x98] sm:$0xff] }
  0x1f   : > { %1467 = vmatpush3.msk.msra.mxu1 %vm411_vm0, %v310_v2  ;;  %1445 = vmatprep.mubr.msk.f32.mxu1 %vm378_vm1, %v1807_v22  ;;  %v353_v38 = vsel %vm335_vm2, %v351_v28, %v352_v29  ;;  %v355_v41 = vsel %vm335_vm2, %v352_v29, %v354_v35  ;;  %v361_v44 = vrot.slane %v1859_v39, 1  ;;  %v362_v45 = vrot.slane %v1871_v42, 1  ;;  %v300_v48 = vld [vmem:[%s1762_s9 + $0x88] sm:$0x1]  ;;  %v303_v56 = vld [vmem:[%s1762_s9 + $0xa0] sm:$0x1] }
  0x20   : > { %1500 = vmatprep.mubr.msk.f32.mxu0 %vm378_vm1, %v1812_v24  ;;  %v358_v46 = vsel %vm335_vm2, %v356_v36, %v357_v37  ;;  %v360_v49 = vsel %vm335_vm2, %v357_v37, %v359_v43  ;;  %v364_v51 = vrot.slane %v300_v48, 1  ;;  %v366_v52 = vrot.slane %v1879_v47, 1  ;;  %v1896_v55 = vld [vmem:[%s1762_s9 + $0xa8] sm:$0xff]  ;;  %v305_v58 = vld [vmem:[%s1762_s9 + $0xb0] sm:$0xff]  ;;  %v307_v63 = vld [vmem:[%s1902_s24] sm:$0xff]  ;;  %s1298_s13 = sshll.u32 %s2052_s26, 1 }
  0x21   : > { %v367_v53 = vrot.slane %v1890_v50, 1  ;;  %v363_v54 = vsel %vm335_vm2, %v361_v44, %v362_v45  ;;  %v369_v59 = vrot.slane %v303_v56, 1  ;;  %v371_v60 = vrot.slane %v1896_v55, 1  ;;  %v306_v0 = vld [vmem:[%s1762_s9 + $0xb8] sm:$0x1]  ;;  %v308_v2 = vld [vmem:[%s1902_s24 + $0x8] sm:$0xff]  ;;  %s280_s28 = scalar_lea.vmem %s2037_s3, %s1298_s13 }
  0x22   : > { %1446 = vmatmul.mubr.msk.f32.gmra.mrb[2].mxu1 %vm378_vm1, %v1821_v25  ;;  %1501 = vmatmul.mubr.msk.f32.gmra.mrb[4].mxu0 %vm378_vm1, %v1824_v26  ;;  %v365_v57 = vsel %vm335_vm2, %v362_v45, %v364_v51  ;;  %v372_v61 = vrot.slane %v305_v58, 1  ;;  %v374_v3 = vrot.slane %v306_v0, 1 }
  0x23   : > { %1448 = vmatprep.mubr.msk.f32.mxu1 %vm378_vm1, %v1835_v30  ;;  %1503 = vmatprep.mubr.msk.f32.mxu0 %vm378_vm1, %v1838_v31  ;;  %v368_v62 = vsel %vm335_vm2, %v366_v52, %v367_v53  ;;  %v370_v1 = vsel %vm335_vm2, %v367_v53, %v369_v59 }
  0x24   : > { %v373_v7 = vsel %vm335_vm2, %v371_v60, %v372_v61  ;;  %v375_v8 = vsel %vm335_vm2, %v372_v61, %v374_v3 }
  0x26   : > { %1449 = vmatmul.mubr.msk.f32.gmra.mrb[4].mxu1 %vm378_vm1, %v1848_v33  ;;  %1504 = vmatmul.mubr.msk.f32.gmra.mrb[6].mxu0 %vm378_vm1, %v1853_v34 }
  0x27   : > { %1451 = vmatprep.mubr.msk.f32.mxu1 %vm378_vm1, %v353_v38  ;;  %1506 = vmatprep.mubr.msk.f32.mxu0 %vm378_vm1, %v1859_v39 }
  0x2a   : > { %1452 = vmatmul.mubr.msk.f32.gmra.mrb[6].mxu1 %vm378_vm1, %v355_v41  ;;  %1507 = vmatmul.mubr.msk.f32.gmra.mrb[8].mxu0 %vm378_vm1, %v1871_v42 }
  0x2b   : > { %1454 = vmatprep.mubr.msk.f32.mxu1 %vm378_vm1, %v358_v46  ;;  %1509 = vmatprep.mubr.msk.f32.mxu0 %vm378_vm1, %v1879_v47 }
  0x2e   : > { %1455 = vmatmul.mubr.msk.f32.gmra.mrb[8].mxu1 %vm378_vm1, %v360_v49  ;;  %1510 = vmatmul.mubr.msk.f32.gmra.mrb[10].mxu0 %vm378_vm1, %v1890_v50 }
  0x2f   : > { %1457 = vmatprep.mubr.msk.f32.mxu1 %vm378_vm1, %v363_v54  ;;  %1512 = vmatprep.mubr.msk.f32.mxu0 %vm378_vm1, %v1896_v55 }
  0x32   : > { %1458 = vmatmul.mubr.msk.f32.gmra.mrb[10].mxu1 %vm378_vm1, %v365_v57  ;;  %1513 = vmatmul.mubr.msk.f32.gmra.mrb[12].mxu0 %vm378_vm1, %v305_v58 }
  0x33   : > { %1460 = vmatprep.mubr.msk.f32.mxu1 %vm378_vm1, %v368_v62  ;;  %1515 = vmatprep.mubr.msk.f32.mxu0 %vm378_vm1, %v307_v63 }
  0x36   : > { %1461 = vmatmul.mubr.msk.f32.gmra.mrb[12].mxu1 %vm378_vm1, %v370_v1  ;;  %1516 = vmatmul.mubr.msk.f32.gmra.mrb[14].mxu0 %vm378_vm1, %v308_v2 }
  0x37   : > { %1463 = vmatprep.mubr.msk.f32.mxu1 %vm378_vm1, %v373_v7  ;;  %1520 = vmatprep.mubr.msk.f32.mxu0 %vm378_vm1, %v1807_v22 }
  0x3a   : > { %1464 = vmatmul.mubr.msk.f32.gmra.mrb[14].mxu1 %vm378_vm1, %v375_v8  ;;  %1521 = vmatmul.mubr.msk.f32.vlgmr.msra.gmra.mrb[0].mxu0 %vm378_vm1, %v1821_v25 }
  0x3b   : > { %1468 = vmatprep.mubr.msk.f32.mxu1 %vm378_vm1, %v1771_v6  ;;  %1523 = vmatprep.mubr.msk.f32.mxu0 %vm378_vm1, %v1835_v30  ;;  %v914_v6 = vrot.slane %v308_v2, 1 }
  0x3e   : > { %1469 = vmatmul.mubr.msk.f32.vlgmr.msra.gmra.mrb[0].mxu1 %vm378_vm1, %v1779_v9  ;;  %1524 = vmatmul.mubr.msk.f32.gmra.mrb[2].mxu0 %vm378_vm1, %v1848_v33 }
  0x3f   : > { %1471 = vmatprep.mubr.msk.f32.mxu1 %vm378_vm1, %v1765_v4  ;;  %1526 = vmatprep.mubr.msk.f32.mxu0 %vm378_vm1, %v353_v38  ;;  %v309_v4 = vld [vmem:[%s1902_s24 + $0x10] sm:$0x1] }
  0x40   : > { %v916_v9 = vrot.slane %v309_v4, 1 }
  0x42   : > { %1472 = vmatmul.mubr.msk.f32.gmra.mrb[2].mxu1 %vm378_vm1, %v1768_v5  ;;  %1527 = vmatmul.mubr.msk.f32.gmra.mrb[4].mxu0 %vm378_vm1, %v355_v41  ;;  %v913_v5 = vrot.slane %v307_v63, 1  ;;  %v917_v11 = vsel %vm335_vm2, %v914_v6, %v916_v9 }
  0x43   : > { %1474 = vmatprep.mubr.msk.f32.mxu1 %vm378_vm1, %v1787_v14  ;;  %1529 = vmatprep.mubr.msk.f32.mxu0 %vm378_vm1, %v358_v46 }
  0x44   : > { %v915_v10 = vsel %vm335_vm2, %v913_v5, %v914_v6 }
  0x46   : > { %1475 = vmatmul.mubr.msk.f32.gmra.mrb[4].mxu1 %vm378_vm1, %v1795_v17  ;;  %1530 = vmatmul.mubr.msk.f32.gmra.mrb[6].mxu0 %vm378_vm1, %v360_v49 }
  0x47   : > { %1477 = vmatprep.mubr.msk.f32.mxu1 %vm378_vm1, %v1812_v24  ;;  %1532 = vmatprep.mubr.msk.f32.mxu0 %vm378_vm1, %v363_v54 }
  0x4a   : > { %1478 = vmatmul.mubr.msk.f32.gmra.mrb[6].mxu1 %vm378_vm1, %v1824_v26  ;;  %1533 = vmatmul.mubr.msk.f32.gmra.mrb[8].mxu0 %vm378_vm1, %v365_v57 }
  0x4b   : > { %1480 = vmatprep.mubr.msk.f32.mxu1 %vm378_vm1, %v1838_v31  ;;  %1535 = vmatprep.mubr.msk.f32.mxu0 %vm378_vm1, %v368_v62 }
  0x4e   : > { %1481 = vmatmul.mubr.msk.f32.gmra.mrb[8].mxu1 %vm378_vm1, %v1853_v34  ;;  %1536 = vmatmul.mubr.msk.f32.gmra.mrb[10].mxu0 %vm378_vm1, %v370_v1 }
  0x4f   : > { %1483 = vmatprep.mubr.msk.f32.mxu1 %vm378_vm1, %v1859_v39  ;;  %1538 = vmatprep.mubr.msk.f32.mxu0 %vm378_vm1, %v373_v7 }
  0x52   : > { %1484 = vmatmul.mubr.msk.f32.gmra.mrb[10].mxu1 %vm378_vm1, %v1871_v42  ;;  %1539 = vmatmul.mubr.msk.f32.gmra.mrb[12].mxu0 %vm378_vm1, %v375_v8 }
  0x53   : > { %1486 = vmatprep.mubr.msk.f32.mxu1 %vm378_vm1, %v1879_v47  ;;  %1541 = vmatprep.mubr.msk.f32.mxu0 %vm378_vm1, %v915_v10 }
  0x56   : > { %1487 = vmatmul.mubr.msk.f32.gmra.mrb[12].mxu1 %vm378_vm1, %v1890_v50  ;;  %1542 = vmatmul.mubr.msk.f32.gmra.mrb[14].mxu0 %vm378_vm1, %v917_v11 }
  0x57   : > { %1489 = vmatprep.mubr.msk.f32.mxu1 %vm378_vm1, %v1896_v55 }
  0x5a   : > { %1490 = vmatmul.mubr.msk.f32.gmra.mrb[14].mxu1 %vm378_vm1, %v305_v58 }
 0x10d   : > { %v1522_v12 = vpop.f32.mrb[0].mxu0 }
 0x10e   : > { %v993_v13 = vpop.f32.mrb[1].mxu0 }
 0x111   : > { %v1470_v14 = vpop.f32.mrb[0].mxu1  ;;  %v1525_v15 = vpop.f32.mrb[2].mxu0 }
 0x112   : > { %v1544_v16 = vadd.f32 %v1522_v12, %v1470_v14  ;;  %v661_v17 = vpop.f32.mrb[1].mxu1  ;;  %v1003_v18 = vpop.f32.mrb[3].mxu0 }
 0x113   : > { %v1545_v19 = vadd.f32 %v993_v13, %v661_v17 }
 0x114   : > { %v1090_v20 = vsel %vm1088_vm3, %v1544_v16, 0.0  ;;  %v1127_v21 = vmul.f32 %v1544_v16, %v1544_v16 }
 0x115   : > { %v1089_v22 = vsel %vm1088_vm3, %v1545_v19, 0.0  ;;  %v1126_v23 = vmul.f32 %v1545_v19, %v1545_v19  ;;  %v1473_v24 = vpop.f32.mrb[2].mxu1  ;;  %v1528_v25 = vpop.f32.mrb[4].mxu0 }
 0x116   : > { %v1143_v26 = vsel %vm1088_vm3, %v1127_v21, 0.0  ;;  %v1091_v27 = vadd.f32 %v1090_v20, %v1089_v22  ;;  %v1546_v28 = vadd.f32 %v1525_v15, %v1473_v24  ;;  %v671_v29 = vpop.f32.mrb[3].mxu1  ;;  %v1013_v30 = vpop.f32.mrb[5].mxu0 }
 0x117   : > { %v1142_v31 = vsel %vm1088_vm3, %v1126_v23, 0.0  ;;  %v1547_v32 = vadd.f32 %v1003_v18, %v671_v29 }
 0x118   : > { %v1144_v33 = vadd.f32 %v1143_v26, %v1142_v31  ;;  %v1129_v34 = vmul.f32 %v1546_v28, %v1546_v28  ;;  %v1094_v43 = vsel %vm1088_vm3, %v1546_v28, 0.0 }
 0x119   : > { %v1092_v35 = vsel %vm1088_vm3, %v1547_v32, 0.0  ;;  %v1128_v36 = vmul.f32 %v1547_v32, %v1547_v32  ;;  %v1476_v37 = vpop.f32.mrb[4].mxu1  ;;  %v1531_v38 = vpop.f32.mrb[6].mxu0 }
 0x11a   : > { %v1093_v39 = vadd.f32 %v1092_v35, %v1091_v27  ;;  %v1548_v40 = vadd.f32 %v1528_v25, %v1476_v37  ;;  %v681_v41 = vpop.f32.mrb[5].mxu1  ;;  %v1023_v42 = vpop.f32.mrb[7].mxu0  ;;  %v1147_v48 = vsel %vm1088_vm3, %v1129_v34, 0.0 }
 0x11b   : > { %v1145_v44 = vsel %vm1088_vm3, %v1128_v36, 0.0  ;;  %v1549_v45 = vadd.f32 %v1013_v30, %v681_v41 }
 0x11c   : > { %v1146_v46 = vadd.f32 %v1145_v44, %v1144_v33  ;;  %v1095_v47 = vadd.f32 %v1094_v43, %v1093_v39  ;;  %v1131_v49 = vmul.f32 %v1548_v40, %v1548_v40  ;;  %v1098_v59 = vsel %vm1088_vm3, %v1548_v40, 0.0 }
 0x11d   : > { %v1096_v50 = vsel %vm1088_vm3, %v1549_v45, 0.0  ;;  %v1130_v51 = vmul.f32 %v1549_v45, %v1549_v45  ;;  %v1479_v52 = vpop.f32.mrb[6].mxu1  ;;  %v1534_v53 = vpop.f32.mrb[8].mxu0 }
 0x11e   : > { %v1097_v54 = vadd.f32 %v1096_v50, %v1095_v47  ;;  %v1148_v55 = vadd.f32 %v1147_v48, %v1146_v46  ;;  %v1550_v56 = vadd.f32 %v1531_v38, %v1479_v52  ;;  %v691_v57 = vpop.f32.mrb[7].mxu1  ;;  %v1033_v58 = vpop.f32.mrb[9].mxu0  ;;  %v1151_v0 = vsel %vm1088_vm3, %v1131_v49, 0.0 }
 0x11f   : > { %v1149_v60 = vsel %vm1088_vm3, %v1130_v51, 0.0  ;;  %v1551_v61 = vadd.f32 %v1023_v42, %v691_v57 }
 0x120   : > { %v1150_v62 = vadd.f32 %v1149_v60, %v1148_v55  ;;  %v1099_v63 = vadd.f32 %v1098_v59, %v1097_v54  ;;  %v1133_v1 = vmul.f32 %v1550_v56, %v1550_v56  ;;  %v1102_v11 = vsel %vm1088_vm3, %v1550_v56, 0.0 }
 0x121   : > { %v1100_v2 = vsel %vm1088_vm3, %v1551_v61, 0.0  ;;  %v1132_v3 = vmul.f32 %v1551_v61, %v1551_v61  ;;  %v1482_v7 = vpop.f32.mrb[8].mxu1  ;;  %v1537_v8 = vpop.f32.mrb[10].mxu0 }
 0x122   : > { %v1101_v4 = vadd.f32 %v1100_v2, %v1099_v63  ;;  %v1152_v5 = vadd.f32 %v1151_v0, %v1150_v62  ;;  %v1552_v6 = vadd.f32 %v1534_v53, %v1482_v7  ;;  %v701_v9 = vpop.f32.mrb[9].mxu1  ;;  %v1043_v10 = vpop.f32.mrb[11].mxu0  ;;  %v1155_v16 = vsel %vm1088_vm3, %v1133_v1, 0.0 }
 0x123   : > { %v1153_v12 = vsel %vm1088_vm3, %v1132_v3, 0.0  ;;  %v1553_v13 = vadd.f32 %v1033_v58, %v701_v9 }
 0x124   : > { %v1154_v14 = vadd.f32 %v1153_v12, %v1152_v5  ;;  %v1103_v15 = vadd.f32 %v1102_v11, %v1101_v4  ;;  %v1135_v17 = vmul.f32 %v1552_v6, %v1552_v6  ;;  %v1106_v27 = vsel %vm1088_vm3, %v1552_v6, 0.0 }
 0x125   : > { %v1104_v18 = vsel %vm1088_vm3, %v1553_v13, 0.0  ;;  %v1134_v19 = vmul.f32 %v1553_v13, %v1553_v13  ;;  %v1485_v20 = vpop.f32.mrb[10].mxu1  ;;  %v1540_v21 = vpop.f32.mrb[12].mxu0 }
 0x126   : > { %v1105_v22 = vadd.f32 %v1104_v18, %v1103_v15  ;;  %v1156_v23 = vadd.f32 %v1155_v16, %v1154_v14  ;;  %v1554_v24 = vadd.f32 %v1537_v8, %v1485_v20  ;;  %v711_v25 = vpop.f32.mrb[11].mxu1  ;;  %v1053_v26 = vpop.f32.mrb[13].mxu0  ;;  %v1159_v32 = vsel %vm1088_vm3, %v1135_v17, 0.0 }
 0x127   : > { %v1157_v28 = vsel %vm1088_vm3, %v1134_v19, 0.0  ;;  %v1555_v29 = vadd.f32 %v1043_v10, %v711_v25 }
 0x128   : > { %v1158_v30 = vadd.f32 %v1157_v28, %v1156_v23  ;;  %v1107_v31 = vadd.f32 %v1106_v27, %v1105_v22  ;;  %v1137_v33 = vmul.f32 %v1554_v24, %v1554_v24  ;;  %v1110_v43 = vsel %vm1088_vm3, %v1554_v24, 0.0 }
 0x129   : > { %v1108_v34 = vsel %vm1088_vm3, %v1555_v29, 0.0  ;;  %v1136_v35 = vmul.f32 %v1555_v29, %v1555_v29  ;;  %v1488_v36 = vpop.f32.mrb[12].mxu1  ;;  %v1543_v37 = vpop.f32.mrb[14].mxu0 }
 0x12a   : > { %v1109_v38 = vadd.f32 %v1108_v34, %v1107_v31  ;;  %v1160_v39 = vadd.f32 %v1159_v32, %v1158_v30  ;;  %v1556_v40 = vadd.f32 %v1540_v21, %v1488_v36  ;;  %v721_v41 = vpop.f32.mrb[13].mxu1  ;;  %v1063_v42 = vpop.f32.mrb[15].mxu0  ;;  %v1163_v48 = vsel %vm1088_vm3, %v1137_v33, 0.0 }
 0x12b   : > { %v1161_v44 = vsel %vm1088_vm3, %v1136_v35, 0.0  ;;  %v1557_v45 = vadd.f32 %v1053_v26, %v721_v41 }
 0x12c   : > { %v1162_v46 = vadd.f32 %v1161_v44, %v1160_v39  ;;  %v1111_v47 = vadd.f32 %v1110_v43, %v1109_v38  ;;  %v1139_v49 = vmul.f32 %v1556_v40, %v1556_v40  ;;  %v1114_v57 = vsel %vm1088_vm3, %v1556_v40, 0.0 }
 0x12d   : > { %v1112_v50 = vsel %vm1088_vm3, %v1557_v45, 0.0  ;;  %v1138_v51 = vmul.f32 %v1557_v45, %v1557_v45  ;;  %v1491_v52 = vpop.f32.mrb[14].mxu1 }
 0x12e   : > { %v1113_v53 = vadd.f32 %v1112_v50, %v1111_v47  ;;  %v1164_v54 = vadd.f32 %v1163_v48, %v1162_v46  ;;  %v1558_v55 = vadd.f32 %v1543_v37, %v1491_v52  ;;  %v731_v56 = vpop.f32.mrb[15].mxu1  ;;  %v1167_v62 = vsel %vm1088_vm3, %v1139_v49, 0.0 }
 0x12f   : > { %v1165_v58 = vsel %vm1088_vm3, %v1138_v51, 0.0  ;;  %v1559_v59 = vadd.f32 %v1063_v42, %v731_v56 }
 0x130   : > { %v1166_v60 = vadd.f32 %v1165_v58, %v1164_v54  ;;  %v1115_v61 = vadd.f32 %v1114_v57, %v1113_v53  ;;  %v1141_v63 = vmul.f32 %v1558_v55, %v1558_v55  ;;  %v1118_v7 = vsel %vm1088_vm3, %v1558_v55, 0.0 }
 0x131   : > { %v1116_v0 = vsel %vm1088_vm3, %v1559_v59, 0.0  ;;  %v1140_v1 = vmul.f32 %v1559_v59, %v1559_v59 }
 0x132   : > { %v1117_v2 = vadd.f32 %v1116_v0, %v1115_v61  ;;  %v1168_v3 = vadd.f32 %v1167_v62, %v1166_v60  ;;  %v1171_v6 = vsel %vm1088_vm3, %v1141_v63, 0.0 }
 0x133   : > { %v1169_v8 = vsel %vm1088_vm3, %v1140_v1, 0.0 }
 0x134   : > { %v1119_v4 = vadd.f32 %v1118_v7, %v1117_v2  ;;  %v1170_v5 = vadd.f32 %v1169_v8, %v1168_v3 }
 0x136   : > { %v1120_v9 = vrot.slane %v1119_v4, 4  ;;  %v1172_v10 = vadd.f32 %v1171_v6, %v1170_v5 }
 0x138   : > { %v1121_v11 = vadd.f32 %v1120_v9, %v1119_v4  ;;  %v1173_v12 = vrot.slane %v1172_v10, 4 }
 0x13a   : > { %v1122_v13 = vrot.slane %v1121_v11, 2  ;;  %v1174_v14 = vadd.f32 %v1173_v12, %v1172_v10 }
 0x13c   : > { %v1123_v15 = vadd.f32 %v1122_v13, %v1121_v11  ;;  %v1175_v16 = vrot.slane %v1174_v14, 2 }
 0x13e   : > { %v1124_v17 = vrot.slane %v1123_v15, 1  ;;  %v1176_v18 = vadd.f32 %v1175_v16, %v1174_v14 }
 0x140   : > { %v1177_v19 = vrot.slane %v1176_v18, 1  ;;  %v1125_v20 = vadd.f32 %v1124_v17, %v1123_v15 }
 0x142   : > { %v1178_v21 = vadd.f32 %v1177_v19, %v1176_v18 }
 0x144   : > { %v1180_v22 = vsel %vm1179_vm4, %v1125_v20, %v1178_v21 }
 0x145   : > { %1182 = vst.msk [vmem:[%s280_s28] sm:$0x3] %vm1181_vm5, %v1180_v22 }
 0x146 PF: > { %s13_s16 = sadd.s32 1, %s1673_s16   ;;  %s2039_s12 = smov %s1665_s14 }
 0x147   : > { %p10_p9 = scmp.ge.s32.totalorder %s13_s16, 6   ;;  %s2040_s13 = smov %s1669_s15 }
 0x148   : > { %s2041_s14 = smov %s2044_s17  ;;  %s2042_s15 = smov %s2048_s18 }
 0x149   :  { %12 = sbr.rel (!%p10_p9) target bundleno = 3 (0x3), region = 68 }

// kernel: upsampler_block.3
= control target key start
LH: loop header
LB: loop body
LE: loop exit
PB: predicated region body
PF: predicated region fallthrough
CT: control target
= control target key end

     0   :  { %s1820_s18 = smov 0   ;;  %s1822_s19 = smov 0   ;;  %s2280_s0 = inlined_call_operand.vmem [shape: f32[2,17,17,4], index: 0, kind: input, shape index: {}, may-alias: {0,1}]   ;;  %s2281_s1 = inlined_call_operand.vmem [shape: f32[2,17,17,4], index: 1, kind: input, shape index: {}, may-alias: {0,1}]   ;;  %s2282_s2 = inlined_call_operand.vmem [shape: f32[4,32,4], index: 2, kind: input, shape index: {}]   ;;  %s2283_s3 = inlined_call_operand.vmem [shape: f32[32,1], index: 3, kind: input, shape index: {}]   ;;  %s2284_s4 = inlined_call_operand.vmem [shape: f32[32,1], index: 4, kind: input, shape index: {}]   ;;  %s2285_s5 = inlined_call_operand.vmem [shape: f32[2,32,256], index: 5, kind: output, shape index: {}]  }
   0x1   :  { %s1824_s20 = smov 0   ;;  %s1826_s21 = smov 0  }
   0x2   :  { %s1828_s22 = smov 0   ;;  %s1830_s23 = smov 0  }
   0x3   :  { %s1832_s24 = smov 0  }
   0x4 LB: > { %s24_s25 = sadd.s32 1, %s1779_s22  ;;  %s27_s26 = sadd.s32 1, %s1783_s23  ;;  %s1787_s24 = sphi %s1832_s24, %s15_s24   ;;  %s1783_s23 = sphi %s1830_s23, %s2294_s23   ;;  %s1779_s22 = sphi %s1828_s22, %s2293_s22   ;;  %s1775_s21 = sphi %s1826_s21, %s2292_s21   ;;  %s1771_s20 = sphi %s1824_s20, %s2291_s20   ;;  %s1767_s19 = sphi %s1822_s19, %s2290_s19   ;;  %s1763_s18 = sphi %s1820_s18, %s2289_s18  }
   0x5   : > { %p25_p0 = scmp.ge.s32.totalorder %s24_s25, 2  ;;  %s1126_s27 = sadd.s32 4294967295, %s1787_s24  }
   0x6   : > { %p169_p1 = scmp.ne.s32.totalorder %s1767_s19, %s1763_s18  ;;  %p170_p2 = scmp.eq.s32.totalorder %s1126_s27, 3 }
   0x7   : > { %s2296_s25 = smov (%p25_p0, %s24_s25), 0  ;;  %s2298_s26 = smov (!%p25_p0, %s27_s26), %s1783_s23 }
   0x8   : > { %s155_s28 = ssub.s32 %s1779_s22, %s2296_s25  ;;  %p29_p3 = scmp.ge.s32.totalorder %s2298_s26, 2 }
   0x9   : > { %p1132_p4 = scmp.ge.s32.totalorder %s1787_s24, 1  ;;  %p1866_p5 = por %p170_p2, %p169_p1 }
   0xa   : > { %p243_p6 = scmp.lt.s32.totalorder %s1787_s24, 5  ;;  %s2300_s26 = smov (%p29_p3, %s2298_s26), 0 }
   0xb   : > { %s154_s30 = ssub.s32 %s1783_s23, %s2300_s26  ;;  %s159_s7 = sadd.s32 1, %s1767_s19 }
   0xc   : > { %p244_p7 = pnand %p1132_p4, %p243_p6  ;;  %s156_s6 = sor.u32 %s155_s28, %s154_s30 }
   0xd   : > { %p157_p8 = scmp.eq.s32.totalorder %s156_s6, 0  ;;  %s1880_s9 = sshll.u32 (!%p244_p7), %s1771_s20, 3  ;;  %vm426_vm0 = vcmask (!%p244_p7), 31744   ;;  %v1182_v0 = vld [vmem:[%s2282_s2 + $0x40] sm:$0xff] (!%p244_p7)  ;;  %vm380_vm2 = vcmask (!%p244_p7), 1046528   ;;  %v915_v41 = vld [vmem:[%s2283_s3 + $0x10] sm:$0xff] (!%p244_p7) }
   0xe   : > { %247 = sbr.rel (%p244_p7) target bundleno = 398 (0x18e), region = 40  ;;  %p297_p9 = scmp.lt.s32.totalorder (!%p244_p7), %s1775_s21, 1  ;;  %1423 = vmatprep.mubr.msk.f32.mxu0 (!%p244_p7), %vm426_vm0, %v1182_v0  ;;  %v1138_v1 = vld [vmem:[%s2282_s2 + $0x20] sm:$0xff] (!%p244_p7)  ;;  %vm1906_vm1 = vmpackc.low (!%p244_p7), %vm426_vm0, %vm426_vm0  ;;  %v1789_v43 = vmov (!%p244_p7), 0   ;;  %v916_v48 = vld [vmem:[%s2283_s3 + $0x18] sm:$0xff] (!%p244_p7) }
   0xf   : > { %s1877_s8 = scalar_select %p157_p8, %s1767_s19, %s159_s7  }
  0x10   : > { %p299_p10 = scmp.lt.s32.totalorder (!%p244_p7), %s1880_s9, 16  ;;  %1347 = vmatprep.mubr.msk.f32.mxu1 (!%p244_p7), %vm426_vm0, %v1138_v1  ;;  %v913_v42 = vld [vmem:[%s2283_s3] sm:$0xff] (!%p244_p7)  ;;  %1732 = vset.pattern.permute.xlu1 (!%p244_p7), %v1789_v43  ;;  %v914_v49 = vld [vmem:[%s2283_s3 + $0x8] sm:$0xff] (!%p244_p7)  ;;  %s313_s30 = sadd.s32 (!%p244_p7), 8, %s1880_s9  ;;  %v944_v62 = vld [vmem:[%s2284_s4 + $0x18] sm:$0xff] (!%p244_p7) }
  0x11   : > { %1731 = vset.pattern.permute.xlu0 (!%p244_p7), %v1789_v43  ;;  %929 = vperm.xlu1 (!%p244_p7), %1732, %v915_v41   ;;  %v942_v56 = vld [vmem:[%s2284_s4 + $0x8] sm:$0xff] (!%p244_p7)  ;;  %v941_v57 = vld [vmem:[%s2284_s4] sm:$0xff] (!%p244_p7)  ;;  %p316_p11 = scmp.lt.s32.totalorder (!%p244_p7), %s313_s30, 16  ;;  %v943_v63 = vld [vmem:[%s2284_s4 + $0x10] sm:$0xff] (!%p244_p7)  ;;  %s288_s10 = sand.u32 (!%p244_p7), 1, %s1763_s18  }
  0x12   : > { %919 = vperm.xlu0 (!%p244_p7), %1731, %v913_v42   ;;  %v1140_v41 = vld [vmem:[%s2282_s2 + $0x30] sm:$0xff] (!%p244_p7)  ;;  %v1141_v42 = vld [vmem:[%s2282_s2 + $0x38] sm:$0xff] (!%p244_p7)  ;;  %v352_v43 = vld [vmem:[%s2282_s2] sm:$0xff] (!%p244_p7)  ;;  %s1133_s11 = sshll.u32 (!%p244_p7), %s288_s10, 5 }
  0x13   : > { %v1209_v2 = vld [vmem:[%s2282_s2 + $0x78] sm:$0xff] (!%p244_p7)  ;;  %s290_s18 = scalar_lea.vmem (!%p244_p7), [#allocation2], %s1133_s11 }
  0x15   : > { %s1892_s14 = scalar_select %p297_p9, %s1775_s21, 1  ;;  %934 = vperm.xlu1 %1732, %v916_v48   ;;  %v1208_v48 = vld [vmem:[%s2282_s2 + $0x70] sm:$0xff] }
  0x16   : > { %s300_s15 = scalar_select %p299_p10, %s1880_s9, 16  ;;  %924 = vperm.xlu0 %1731, %v914_v49   ;;  %v353_v49 = vld [vmem:[%s2282_s2 + $0x8] sm:$0xff] }
  0x17   : > { %s1672_s16 = smul.u32 51, %s1892_s14  ;;  %s2302_s30 = smov (!%p316_p11, %s313_s30), 16 }
  0x18   : > { %s1671_s17 = smul.u32 3, %s300_s15 }
  0x19   : > { %952 = vperm.xlu1 %1732, %v942_v56  }
  0x1a   : > { %s303_s27 = sadd.s32 %s1672_s16, %s1671_s17  ;;  %947 = vperm.xlu0 %1731, %v941_v57  }
  0x1b   : > { %s1135_s28 = sshll.u32 %s303_s27, 3  ;;  %s1673_s27 = smul.u32 3, %s2302_s30 }
  0x1c   : > { %s1902_s7 = scalar_lea.vmem %s2280_s0, %s1135_s28 }
  0x1d   : > { %v328_v3 = vld [vmem:[%s1902_s7 + $0x18] sm:$0xff]  ;;  %v329_v4 = vld [vmem:[%s1902_s7 + $0x20] sm:$0xff]  ;;  %v1918_v9 = vld [vmem:[%s1902_s7 + $0x8] sm:$0xff]  ;;  %962 = vperm.xlu1 %1732, %v944_v62   ;;  %s320_s28 = sadd.s32 %s1673_s27, %s1672_s16 }
  0x1e   : > { %v1913_v5 = vld [vmem:[%s1902_s7] sm:$0xff]  ;;  %v386_v6 = vrot.slane %v328_v3, 1  ;;  %v387_v7 = vrot.slane %v329_v4, 1  ;;  %v1915_v8 = vpack.c.bf16 %v329_v4, %v328_v3  ;;  %v327_v10 = vld [vmem:[%s1902_s7 + $0x10] sm:$0x1]  ;;  %v382_v12 = vrot.slane %v1918_v9, 1  ;;  %957 = vperm.xlu0 %1731, %v943_v63  }
  0x1f   : > { %v381_v11 = vrot.slane %v1913_v5, 1  ;;  %v384_v13 = vrot.slane %v327_v10, 1  ;;  %v331_v14 = vld [vmem:[%s1902_s7 + $0x30] sm:$0xff]  ;;  %v332_v15 = vld [vmem:[%s1902_s7 + $0x38] sm:$0xff]  ;;  %v330_v16 = vld [vmem:[%s1902_s7 + $0x28] sm:$0x1] }
  0x20   : > { %1565 = vmatprep.subr.msk.bf16.mxu0 %vm1906_vm1, %v1915_v8  ;;  %v1929_v17 = vpack.c.bf16 %v332_v15, %v331_v14  ;;  %v333_v18 = vld [vmem:[%s1902_s7 + $0x40] sm:$0x1]  ;;  %v388_v21 = vsel %vm380_vm2, %v386_v6, %v387_v7  ;;  %v389_v22 = vrot.slane %v330_v16, 1  ;;  %v391_v24 = vrot.slane %v331_v14, 1  ;;  %v334_v27 = vld [vmem:[%s1902_s7 + $0x48] sm:$0xff]  ;;  %v335_v28 = vld [vmem:[%s1902_s7 + $0x50] sm:$0xff] }
  0x21   : > { %1568 = vmatpush3.bf16.xpose.msk.msra.mxu0 %vm1906_vm1, %v1915_v8  ;;  %v383_v19 = vsel %vm380_vm2, %v381_v11, %v382_v12  ;;  %v385_v20 = vsel %vm380_vm2, %v382_v12, %v384_v13  ;;  %v392_v25 = vrot.slane %v332_v15, 1  ;;  %v394_v29 = vrot.slane %v333_v18, 1  ;;  %v336_v34 = vld [vmem:[%s1902_s7 + $0x58] sm:$0x1]  ;;  %v337_v38 = vld [vmem:[%s1902_s7 + $0x60] sm:$0xff]  ;;  %v338_v39 = vld [vmem:[%s1902_s7 + $0x68] sm:$0xff] }
  0x22   : > { %v1467_v23 = vpack.c.bf16 %v385_v20, %v383_v19  ;;  %1571 = vmatprep.subr.msk.bf16.mxu0 %vm1906_vm1, %v1929_v17  ;;  %v390_v26 = vsel %vm380_vm2, %v387_v7, %v389_v22  ;;  %v1953_v31 = vpack.c.bf16 %v335_v28, %v334_v27  ;;  %v396_v36 = vrot.slane %v334_v27, 1  ;;  %v339_v47 = vld [vmem:[%s1902_s7 + $0x70] sm:$0x1]  ;;  %v340_v53 = vld [vmem:[%s1902_s7 + $0x78] sm:$0xff]  ;;  %v341_v54 = vld [vmem:[%s1902_s7 + $0x80] sm:$0xff]  ;;  %s1137_s30 = sshll.u32 %s320_s28, 3 }
  0x23   : > { %v1946_v30 = vpack.c.bf16 %v390_v26, %v388_v21  ;;  %v393_v32 = vsel %vm380_vm2, %v391_v24, %v392_v25  ;;  %v395_v33 = vsel %vm380_vm2, %v392_v25, %v394_v29  ;;  %v397_v37 = vrot.slane %v335_v28, 1  ;;  %v342_v61 = vld [vmem:[%s1902_s7 + $0x88] sm:$0x1]  ;;  %v343_v4 = vld [vmem:[%s1902_s7 + $0x90] sm:$0xff]  ;;  %v344_v6 = vld [vmem:[%s1902_s7 + $0x98] sm:$0xff]  ;;  %s2071_s6 = scalar_lea.vmem %s2281_s1, %s1137_s30 }
  0x24   : > { %1469 = vmatprep.subr.msk.bf16.mxu1 %vm1906_vm1, %v1467_v23  ;;  %v1964_v35 = vpack.c.bf16 %v395_v33, %v393_v32  ;;  %v399_v40 = vrot.slane %v336_v34, 1  ;;  %v1980_v44 = vpack.c.bf16 %v338_v39, %v337_v38  ;;  %v401_v51 = vrot.slane %v337_v38, 1  ;;  %v345_v13 = vld [vmem:[%s1902_s7 + $0xa0] sm:$0x1]  ;;  %v346_v18 = vld [vmem:[%s1902_s7 + $0xa8] sm:$0xff]  ;;  %v347_v19 = vld [vmem:[%s1902_s7 + $0xb0] sm:$0xff] }
  0x25   : > { %1472 = vmatpush3.bf16.xpose.msk.msra.mxu1 %vm1906_vm1, %v1467_v23  ;;  %v398_v45 = vsel %vm380_vm2, %v396_v36, %v397_v37  ;;  %v402_v52 = vrot.slane %v338_v39, 1  ;;  %v404_v55 = vrot.slane %v339_v47, 1  ;;  %v2014_v58 = vpack.c.bf16 %v341_v54, %v340_v53  ;;  %v348_v24 = vld [vmem:[%s1902_s7 + $0xb8] sm:$0x1]  ;;  %v349_v28 = vld [vmem:[%s2071_s6] sm:$0xff]  ;;  %v350_v29 = vld [vmem:[%s2071_s6 + $0x8] sm:$0xff] }
  0x26   : > { %1475 = vmatprep.subr.msk.bf16.mxu1 %vm1906_vm1, %v1946_v30  ;;  %v400_v46 = vsel %vm380_vm2, %v397_v37, %v399_v40  ;;  %v406_v1 = vrot.slane %v340_v53, 1  ;;  %v407_v3 = vrot.slane %v341_v54, 1  ;;  %v409_v7 = vrot.slane %v342_v61, 1  ;;  %v1183_v39 = vld [vmem:[%s2282_s2 + $0x48] sm:$0xff]  ;;  %v1184_v40 = vld [vmem:[%s2282_s2 + $0x50] sm:$0xff] }
  0x27   : > { %v1997_v50 = vpack.c.bf16 %v400_v46, %v398_v45  ;;  %v403_v59 = vsel %vm380_vm2, %v401_v51, %v402_v52  ;;  %v405_v60 = vsel %vm380_vm2, %v402_v52, %v404_v55  ;;  %v2041_v10 = vpack.c.bf16 %v344_v6, %v343_v4  ;;  %v1207_v47 = vld [vmem:[%s2282_s2 + $0x68] sm:$0xff]  ;;  %v355_v51 = vld [vmem:[%s2282_s2 + $0x18] sm:$0xff] }
  0x28   : > { %v2031_v0 = vpack.c.bf16 %v405_v60, %v403_v59  ;;  %v408_v11 = vsel %vm380_vm2, %v406_v1, %v407_v3  ;;  %v410_v12 = vsel %vm380_vm2, %v407_v3, %v409_v7  ;;  %v411_v15 = vrot.slane %v343_v4, 1 }
  0x29   : > { %1574 = vmatpush3.bf16.xpose.msk.msra.mxu0 %vm1906_vm1, %v1929_v17  ;;  %v2052_v14 = vpack.c.bf16 %v410_v12, %v408_v11  ;;  %v412_v16 = vrot.slane %v344_v6, 1  ;;  %v414_v20 = vrot.slane %v345_v13, 1  ;;  %v2064_v21 = vpack.c.bf16 %v347_v19, %v346_v18 }
  0x2a   : > { %1577 = vmatprep.subr.msk.bf16.mxu0 %vm1906_vm1, %v1953_v31  ;;  %v416_v26 = vrot.slane %v346_v18, 1  ;;  %v417_v27 = vrot.slane %v347_v19, 1  ;;  %v419_v32 = vrot.slane %v348_v24, 1  ;;  %v1605_v33 = vpack.c.bf16 %v350_v29, %v349_v28 }
  0x2b   : > { %v413_v22 = vsel %vm380_vm2, %v411_v15, %v412_v16  ;;  %v415_v23 = vsel %vm380_vm2, %v412_v16, %v414_v20  ;;  %v1515_v38 = vpack.c.bf16 %v1918_v9, %v1913_v5  ;;  %v1139_v5 = vld [vmem:[%s2282_s2 + $0x28] sm:$0xff]  ;;  %v1185_v9 = vld [vmem:[%s2282_s2 + $0x58] sm:$0xff] }
  0x2c   : > { %v1503_v25 = vpack.c.bf16 %v415_v23, %v413_v22  ;;  %v418_v34 = vsel %vm380_vm2, %v416_v26, %v417_v27  ;;  %v420_v36 = vsel %vm380_vm2, %v417_v27, %v419_v32 }
  0x2d   : > { %1478 = vmatpush3.bf16.xpose.msk.msra.mxu1 %vm1906_vm1, %v1946_v30  ;;  %v1509_v37 = vpack.c.bf16 %v420_v36, %v418_v34 }
  0x2e   : > { %1481 = vmatprep.subr.msk.bf16.mxu1 %vm1906_vm1, %v1964_v35 }
  0x31   : > { %1580 = vmatpush3.bf16.xpose.msk.msra.mxu0 %vm1906_vm1, %v1953_v31 }
  0x32   : > { %1583 = vmatprep.subr.msk.bf16.mxu0 %vm1906_vm1, %v1980_v44 }
  0x35   : > { %1484 = vmatpush3.bf16.xpose.msk.msra.mxu1 %vm1906_vm1, %v1964_v35 }
  0x36   : > { %1487 = vmatprep.subr.msk.bf16.mxu1 %vm1906_vm1, %v1997_v50 }
  0x39   : > { %1586 = vmatpush3.bf16.xpose.msk.msra.mxu0 %vm1906_vm1, %v1980_v44 }
  0x3a   : > { %1589 = vmatprep.subr.msk.bf16.mxu0 %vm1906_vm1, %v2014_v58 }
  0x3d   : > { %1490 = vmatpush3.bf16.xpose.msk.msra.mxu1 %vm1906_vm1, %v1997_v50 }
  0x3e   : > { %1493 = vmatprep.subr.msk.bf16.mxu1 %vm1906_vm1, %v2031_v0 }
  0x41   : > { %1592 = vmatpush3.bf16.xpose.msk.msra.mxu0 %vm1906_vm1, %v2014_v58 }
  0x42   : > { %1595 = vmatprep.subr.msk.bf16.mxu0 %vm1906_vm1, %v2041_v10 }
  0x45   : > { %1496 = vmatpush3.bf16.xpose.msk.msra.mxu1 %vm1906_vm1, %v2031_v0 }
  0x46   : > { %1499 = vmatprep.subr.msk.bf16.mxu1 %vm1906_vm1, %v2052_v14 }
  0x49   : > { %1598 = vmatpush3.bf16.xpose.msk.msra.mxu0 %vm1906_vm1, %v2041_v10 }
  0x4a   : > { %1601 = vmatprep.subr.msk.bf16.mxu0 %vm1906_vm1, %v2064_v21 }
  0x4d   : > { %1502 = vmatpush3.bf16.xpose.msk.msra.mxu1 %vm1906_vm1, %v2052_v14 }
  0x4e   : > { %1505 = vmatprep.subr.msk.bf16.mxu1 %vm1906_vm1, %v1503_v25 }
  0x51   : > { %1604 = vmatpush3.bf16.xpose.msk.msra.mxu0 %vm1906_vm1, %v2064_v21 }
  0x52   : > { %1607 = vmatprep.subr.msk.bf16.mxu0 %vm1906_vm1, %v1605_v33 }
  0x55   : > { %1508 = vmatpush3.bf16.xpose.msk.msra.mxu1 %vm1906_vm1, %v1503_v25 }
  0x56   : > { %1511 = vmatprep.subr.msk.bf16.mxu1 %vm1906_vm1, %v1509_v37 }
  0x59   : > { %1610 = vmatpush3.bf16.xpose.msk.msra.mxu0 %vm1906_vm1, %v1605_v33 }
  0x5a   : > { %1613 = vmatprep.subr.msk.bf16.mxu0 %vm1906_vm1, %v1946_v30 }
  0x5d   : > { %1514 = vmatpush3.bf16.xpose.msk.msra.mxu1 %vm1906_vm1, %v1509_v37 }
  0x5e   : > { %1517 = vmatprep.subr.msk.bf16.mxu1 %vm1906_vm1, %v1515_v38 }
  0x60   : > { %1424 = vmatmul.mubr.msk.f32.vlgmr.msra.gmra.mrb[0].mxu0 %vm426_vm0, %v1183_v39 }
  0x61   : > { %1616 = vmatpush3.bf16.xpose.msk.msra.mxu0 %vm1906_vm1, %v1946_v30  ;;  %1426 = vmatprep.mubr.msk.f32.mxu0 %vm426_vm0, %v1184_v40  ;;  %v1206_v30 = vld [vmem:[%s2282_s2 + $0x60] sm:$0xff] }
  0x62   : > { %1619 = vmatprep.subr.msk.bf16.mxu0 %vm1906_vm1, %v1964_v35 }
  0x64   : > { %1348 = vmatmul.mubr.msk.f32.vlgmr.msra.gmra.mrb[0].mxu1 %vm426_vm0, %v1139_v5  ;;  %1427 = vmatmul.mubr.msk.f32.gmra.mrb[2].mxu0 %vm426_vm0, %v1185_v9 }
  0x65   : > { %1520 = vmatpush3.bf16.xpose.msk.msra.mxu1 %vm1906_vm1, %v1515_v38  ;;  %1350 = vmatprep.mubr.msk.f32.mxu1 %vm426_vm0, %v1140_v41 }
  0x66   : > { %1523 = vmatprep.subr.msk.bf16.mxu1 %vm1906_vm1, %v1915_v8  ;;  %1461 = vmatprep.mubr.msk.f32.mxu0 %vm426_vm0, %v1206_v30 }
  0x68   : > { %1351 = vmatmul.mubr.msk.f32.gmra.mrb[2].mxu1 %vm426_vm0, %v1141_v42 }
  0x69   : > { %1622 = vmatpush3.bf16.xpose.msk.msra.mxu0 %vm1906_vm1, %v1964_v35  ;;  %1385 = vmatprep.mubr.msk.f32.mxu1 %vm426_vm0, %v352_v43 }
  0x6a   : > { %1625 = vmatprep.subr.msk.bf16.mxu0 %vm1906_vm1, %v1997_v50 }
  0x6d   : > { %1526 = vmatpush3.bf16.xpose.msk.msra.mxu1 %vm1906_vm1, %v1915_v8  ;;  %v351_v8 = vld [vmem:[%s2071_s6 + $0x10] sm:$0x1]  ;;  %s1231_s6 = sshll.u32 (%p1866_p5), %s1775_s21, 3 }
  0x6e   : > { %1529 = vmatprep.subr.msk.bf16.mxu1 %vm1906_vm1, %v1929_v17  ;;  %v801_v35 = vrot.slane %v351_v8, 1  ;;  %s985_s12 = sadd.s32 (%p1866_p5), %s1771_s20, %s1231_s6 }
  0x6f   : > { %s1232_s9 = sshll.u32 (%p1866_p5), %s985_s12, 3 }
  0x70   : > { %s987_s17 = scalar_lea.vmem (%p1866_p5), %s2285_s5, %s1232_s9 }
  0x71   : > { %1628 = vmatpush3.bf16.xpose.msk.msra.mxu0 %vm1906_vm1, %v1997_v50  ;;  %v354_v50 = vld [vmem:[%s2282_s2 + $0x10] sm:$0xff] }
  0x72   : > { %1631 = vmatprep.subr.msk.bf16.mxu0 %vm1906_vm1, %v2031_v0 }
  0x75   : > { %1532 = vmatpush3.bf16.xpose.msk.msra.mxu1 %vm1906_vm1, %v1929_v17  ;;  %v798_v17 = vrot.slane %v349_v28, 1 }
  0x76   : > { %1535 = vmatprep.subr.msk.bf16.mxu1 %vm1906_vm1, %v1953_v31 }
  0x79   : > { %1634 = vmatpush3.bf16.xpose.msk.msra.mxu0 %vm1906_vm1, %v2031_v0 }
  0x7a   : > { %1637 = vmatprep.subr.msk.bf16.mxu0 %vm1906_vm1, %v2052_v14 }
  0x7d   : > { %1538 = vmatpush3.bf16.xpose.msk.msra.mxu1 %vm1906_vm1, %v1953_v31  ;;  %v799_v31 = vrot.slane %v350_v29, 1 }
  0x7e   : > { %1541 = vmatprep.subr.msk.bf16.mxu1 %vm1906_vm1, %v1980_v44 }
  0x7f   : > { %v800_v45 = vsel %vm380_vm2, %v798_v17, %v799_v31  ;;  %v802_v46 = vsel %vm380_vm2, %v799_v31, %v801_v35 }
  0x81   : > { %1640 = vmatpush3.bf16.xpose.msk.msra.mxu0 %vm1906_vm1, %v2052_v14 }
  0x82   : > { %1643 = vmatprep.subr.msk.bf16.mxu0 %vm1906_vm1, %v1503_v25 }
  0x85   : > { %1544 = vmatpush3.bf16.xpose.msk.msra.mxu1 %vm1906_vm1, %v1980_v44  ;;  %v1653_v44 = vpack.c.bf16 %v802_v46, %v800_v45 }
  0x86   : > { %1547 = vmatprep.subr.msk.bf16.mxu1 %vm1906_vm1, %v2014_v58 }
  0x89   : > { %1646 = vmatpush3.bf16.xpose.msk.msra.mxu0 %vm1906_vm1, %v1503_v25 }
  0x8a   : > { %1649 = vmatprep.subr.msk.bf16.mxu0 %vm1906_vm1, %v1509_v37 }
  0x8d   : > { %1550 = vmatpush3.bf16.xpose.msk.msra.mxu1 %vm1906_vm1, %v2014_v58 }
  0x8e   : > { %1553 = vmatprep.subr.msk.bf16.mxu1 %vm1906_vm1, %v2041_v10 }
  0x90   : > { %v930_v52 = vpop.permute.xlu1 %929 }
  0x91   : > { %1652 = vmatpush3.bf16.xpose.msk.msra.mxu0 %vm1906_vm1, %v1509_v37  ;;  %v920_v53 = vpop.permute.xlu0 %919 }
  0x92   : > { %1655 = vmatprep.subr.msk.bf16.mxu0 %vm1906_vm1, %v1653_v44 }
  0x94   : > { %v935_v54 = vpop.permute.xlu1 %934 }
  0x95   : > { %1556 = vmatpush3.bf16.xpose.msk.msra.mxu1 %vm1906_vm1, %v2041_v10  ;;  %v925_v56 = vpop.permute.xlu0 %924 }
  0x96   : > { %1559 = vmatprep.subr.msk.bf16.mxu1 %vm1906_vm1, %v2064_v21 }
  0x98   : > { %v953_v63 = vpop.permute.xlu1 %952 }
  0x99   : > { %1658 = vmatpush3.bf16.xpose.msk.msra.mxu0 %vm1906_vm1, %v1653_v44  ;;  %v948_v1 = vpop.permute.xlu0 %947 }
  0x9c   : > { %v963_v16 = vpop.permute.xlu1 %962 }
  0x9d   : > { %1562 = vmatpush3.bf16.xpose.msk.msra.mxu1 %vm1906_vm1, %v2064_v21  ;;  %v958_v20 = vpop.permute.xlu0 %957 }
  0xa0   : > { %1462 = vmatmul.mubr.msk.f32.vlgmr.msra.gmra.mrb[0].mxu0 %vm426_vm0, %v1207_v47 }
  0xa1   : > { %1464 = vmatprep.mubr.msk.f32.mxu0 %vm426_vm0, %v1208_v48 }
  0xa4   : > { %1386 = vmatmul.mubr.msk.f32.vlgmr.msra.gmra.mrb[0].mxu1 %vm426_vm0, %v353_v49  ;;  %1465 = vmatmul.mubr.msk.f32.gmra.mrb[2].mxu0 %vm426_vm0, %v1209_v2 }
  0xa5   : > { %1388 = vmatprep.mubr.msk.f32.mxu1 %vm426_vm0, %v354_v50 }
  0xa8   : > { %1389 = vmatmul.mubr.msk.f32.gmra.mrb[2].mxu1 %vm426_vm0, %v355_v51 }
 0x173   : > { %v1463_v55 = vpop.f32.mrb[0].mxu0 }
 0x174   : > { %v890_v57 = vpop.f32.mrb[1].mxu0 }
 0x177   : > { %v1387_v58 = vpop.f32.mrb[0].mxu1  ;;  %v1466_v59 = vpop.f32.mrb[2].mxu0 }
 0x178   : > { %v1659_v60 = vadd.f32 %v1463_v55, %v1387_v58  ;;  %v666_v61 = vpop.f32.mrb[1].mxu1  ;;  %v900_v62 = vpop.f32.mrb[3].mxu0 }
 0x179   : > { %v1660_v0 = vadd.f32 %v890_v57, %v666_v61 }
 0x17a   : > { %v938_v3 = vmul.f32 %v1659_v60, %v925_v56 }
 0x17b   : > { %v937_v4 = vmul.f32 %v1660_v0, %v920_v53  ;;  %v1390_v6 = vpop.f32.mrb[2].mxu1 }
 0x17c   : > { %v966_v7 = vadd.f32 %v953_v63, %v938_v3  ;;  %v1661_v10 = vadd.f32 %v1466_v59, %v1390_v6  ;;  %v676_v11 = vpop.f32.mrb[3].mxu1 }
 0x17d   : > { %v965_v12 = vadd.f32 %v948_v1, %v937_v4  ;;  %v1662_v13 = vadd.f32 %v900_v62, %v676_v11 }
 0x17e   : > { %v970_v14 = vmax.f32 %v966_v7, 0.0  ;;  %v940_v15 = vmul.f32 %v1661_v10, %v935_v54 }
 0x17f   : > { %v969_v18 = vmax.f32 %v965_v12, 0.0  ;;  %v939_v19 = vmul.f32 %v1662_v13, %v930_v52  ;;  %983 = sbr.rel (!%p1866_p5) target bundleno = 398 (0x18e), region = 44 }
 0x180   : > { %974 = vst [vmem:[%s290_s18 + $0x8] sm:$0xff] %v970_v14  ;;  %v968_v21 = vadd.f32 %v963_v16, %v940_v15 }
 0x181   : > { %973 = vst [vmem:[%s290_s18] sm:$0xff] %v969_v18  ;;  %v967_v22 = vadd.f32 %v958_v20, %v939_v19 }
 0x182   : > { %v972_v23 = vmax.f32 %v968_v21, 0.0 }
 0x183   : > { %v971_v24 = vmax.f32 %v967_v22, 0.0 }
 0x184   : > { %976 = vst [vmem:[%s290_s18 + $0x18] sm:$0xff] %v972_v23 }
 0x185   : > { %975 = vst [vmem:[%s290_s18 + $0x10] sm:$0xff] %v971_v24 }
 0x187   : > { %v1023_v26 = vld [vmem:[%s290_s18 + $0x8] sm:$0xff] }
 0x188   : > { %v1021_v25 = vld [vmem:[%s290_s18] sm:$0xff]  ;;  %1024 = vst [vmem:[%s987_s17 + $0x10] sm:$0xff] %v1023_v26 }
 0x189   : > { %1022 = vst [vmem:[%s987_s17] sm:$0xff] %v1021_v25 }
 0x18b   : > { %v1027_v28 = vld [vmem:[%s290_s18 + $0x18] sm:$0xff] }
 0x18c   : > { %v1025_v27 = vld [vmem:[%s290_s18 + $0x10] sm:$0xff]  ;;  %1028 = vst [vmem:[%s987_s17 + $0x30] sm:$0xff] %v1027_v28 }
 0x18d   : > { %1026 = vst [vmem:[%s987_s17 + $0x20] sm:$0xff] %v1025_v27 }
 0x18e PF: > { %s15_s24 = sadd.s32 1, %s1787_s24   ;;  %s2289_s18 = smov %s1767_s19 }
 0x18f   : > { %p12_p12 = scmp.ge.s32.totalorder %s15_s24, 6   ;;  %s2290_s19 = smov %s1877_s8 }
 0x190   : > { %s2291_s20 = smov %s1779_s22  ;;  %s2292_s21 = smov %s1783_s23 }
 0x191   : > { %s2293_s22 = smov %s2296_s25  ;;  %s2294_s23 = smov %s2300_s26 }
 0x192   :  { %14 = sbr.rel (!%p12_p12) target bundleno = 4 (0x4), region = 114 }

</bundles_post_ra>
